<compile_context>
chip_gen: v7x
topology: tpu7x:2x2x1
jax: 0.10.0
libtpu: 0.0.40
codegen_flags: <defaults>
</compile_context>

<pallas_src>
import numpy as np
import jax
import jax.numpy as jnp
from jax.experimental import pallas as pl
from jax.experimental.pallas import tpu as pltpu

_EPS = 1e-5  # nn.BatchNorm2d default


def _make_downblock_kernel(N, Hp, Wp, eps=_EPS):
    """Build the kernel body with the static geometry baked in via closure.

    Flat padded coordinate system (per conv): f = n*F + i_pad*Wq + j_pad, where
    Wq = Wp+2 and F = (Hp+2)*Wq.  Data lives at i_pad, j_pad >= 1; the pad ring
    is zero.  A 3x3 tap (dh, dw) is then a constant lane offset dh*Wq + dw, so
    the whole conv is one matmul against 9 shifted slices of the same buffer.
    Output pixel (n, i, j) lands at flat index n*F + i*Wq + j; positions that do
    not correspond to a real pixel are garbage and are masked / stripped.
    """
    Wq = Wp + 2                  # padded row width
    F = (Hp + 2) * Wq            # padded flat size per sample
    NF = N * F                   # total flat size
    Lv = NF - 2 * Wq - 2         # slice length covering every valid output pixel
    Mv = N * Hp * Wp             # number of valid pixels (BN normalizer)
    NHp = N * Hp

    def kernel(xe_ref, xo_ref, w1t_ref, g1_ref, bt1_ref,
               w2t_ref, g2_ref, bt2_ref, mask_ref,
               o_ref, p1_ref, col1_ref, p2_ref, col2_ref):
        Cout = w2t_ref.shape[0]

        # ---------------- MaxPool2d(kernel=2, stride=2) ----------------
        # W pairs were de-interleaved by the wrapper (xe = even cols, xo = odd);
        # H pairs come from sublane-strided loads -> no lane-strided access.
        a = xe_ref[:, pl.ds(0, NHp, 2), :]
        b = xo_ref[:, pl.ds(0, NHp, 2), :]
        c = xe_ref[:, pl.ds(1, NHp, 2), :]
        d = xo_ref[:, pl.ds(1, NHp, 2), :]
        pooled = jnp.maximum(jnp.maximum(a, b), jnp.maximum(c, d))  # (Cin, N*Hp, Wp)

        # ------- lay pooled rows into the flat zero-padded image p1 -------
        p1_ref[...] = jnp.zeros_like(p1_ref)   # flat layout -> this is a tiny store
        for n in range(N):
            for i in range(Hp):
                off = n * F + (i + 1) * Wq + 1
                p1_ref[:, pl.ds(off, Wp)] = pooled[:, n * Hp + i, :]

        mask = mask_ref[...]                   # (1, Lv): 1.0 on valid output pixels

        def conv3x3_bn_relu(pflat_ref, col_ref, wt_ref, g_ref, bt_ref):
            """3x3 'SAME' conv as a single K=9*C matmul + fused training-mode BN + ReLU."""
            C = pflat_ref.shape[0]
            # im2col: 9 static lane-offset views of the flat padded image.
            for dh in range(3):
                for dw in range(3):
                    tap = dh * 3 + dw
                    col_ref[pl.ds(tap * C, C), :] = pflat_ref[:, pl.ds(dh * Wq + dw, Lv)]
            acc = jnp.dot(wt_ref[...], col_ref[...],
                          preferred_element_type=jnp.float32)         # (Co, Lv)
            # one-pass masked batch statistics (biased variance, training mode)
            am = acc * mask
            s = jnp.sum(am, axis=1, keepdims=True)                     # (Co, 1)
            ss = jnp.sum(am * acc, axis=1, keepdims=True)              # (Co, 1)
            mean = s * (1.0 / Mv)
            var = ss * (1.0 / Mv) - mean * mean
            scale = g_ref[...] * jax.lax.rsqrt(var + eps)              # (Co, 1)
            shift = bt_ref[...] - mean * scale
            # fused BN + ReLU: one per-channel FMA + max  (conv bias omitted:
            # it is cancelled exactly by the mean subtraction above)
            return jnp.maximum(acc * scale + shift, 0.0)               # (Co, Lv)

        # ---------------- Conv1 + BN1 + ReLU ----------------
        y1 = conv3x3_bn_relu(p1_ref, col1_ref, w1t_ref, g1_ref, bt1_ref) * mask

        # Stage y1 into the flat padded layout for conv2: the data moves by
        # exactly one pad row + one pad col, i.e. a single lane shift of Wq+1.
        p2_ref[...] = jnp.zeros_like(p2_ref)
        p2_ref[:, pl.ds(Wq + 1, Lv)] = y1

        # ---------------- Conv2 + BN2 + ReLU ----------------
        y2 = conv3x3_bn_relu(p2_ref, col2_ref, w2t_ref, g2_ref, bt2_ref)

        # Lane-dense writeback of the flat layout; the wrapper strips pad lanes.
        o_ref[:, pl.ds(0, Lv)] = y2
        o_ref[:, pl.ds(Lv, NF - Lv)] = jnp.zeros((Cout, NF - Lv), jnp.float32)

    return kernel


def down_block(x_nchw, params):
    """DownBlock forward.  x_nchw: (N, Cin, H, W) f32 -> (N, Cout, H//2, W//2)."""
    w1, b1, g1, bt1, w2, b2, g2, bt2 = params
    del b1, b2  # conv bias is cancelled exactly by training-mode BatchNorm
    N, Cin, H, W = x_nchw.shape
    assert H % 2 == 0 and W % 2 == 0, "MaxPool2d(2) layout assumes even H, W"
    Hp, Wp = H // 2, W // 2
    Cmid = w1.shape[-1]
    Cout = w2.shape[-1]
    Wq = Wp + 2
    F = (Hp + 2) * Wq
    NF = N * F
    Lv = NF - 2 * Wq - 2

    # ---- layout plumbing (XLA side): channel-major, de-interleave W pairs ----
    xc = jnp.transpose(x_nchw, (1, 0, 2, 3)).reshape(Cin, N * H, W).astype(jnp.float32)
    xe = xc[:, :, 0::2]          # even W columns  (Cin, N*H, Wp)
    xo = xc[:, :, 1::2]          # odd  W columns  (Cin, N*H, Wp)

    # HWIO weights -> (Cout, 9*Cin): column index = (3*dh + dw)*Cin + ci
    w1t = jnp.asarray(w1, jnp.float32).reshape(9 * Cin, Cmid).T
    w2t = jnp.asarray(w2, jnp.float32).reshape(9 * Cmid, Cout).T

    # validity mask over the flat padded coordinate f = n*F + i*Wq + j
    f = np.arange(Lv)
    r = f % F
    valid = ((r // Wq) < Hp) & ((r % Wq) < Wp)
    mask = jnp.asarray(valid.astype(np.float32)).reshape(1, Lv)

    vmem = pl.BlockSpec(memory_space=pltpu.MemorySpace.VMEM)
    n_elems = (xe.size + xo.size + w1t.size + w2t.size
               + 2 * Cmid + 2 * Cout + Lv
               + Cout * NF + Cin * NF + Cmid * NF
               + 9 * Cin * Lv + 9 * Cmid * Lv)
    vmem_limit = int(min(48 * 2**20, max(16 * 2**20, 8 * 4 * n_elems)))

    kernel = _make_downblock_kernel(N, Hp, Wp)
    out_flat = pl.pallas_call(
        kernel,
        out_shape=jax.ShapeDtypeStruct((Cout, NF), jnp.float32),
        in_specs=[vmem] * 9,
        out_specs=vmem,
        scratch_shapes=[
            pltpu.VMEM((Cin, NF), jnp.float32),        # p1: flat padded pooled input
            pltpu.VMEM((9 * Cin, Lv), jnp.float32),    # col1: im2col for conv1
            pltpu.VMEM((Cmid, NF), jnp.float32),       # p2: flat padded conv1 output
            pltpu.VMEM((9 * Cmid, Lv), jnp.float32),   # col2: im2col for conv2
        ],
        compiler_params=pltpu.CompilerParams(vmem_limit_bytes=vmem_limit),
    )(xe, xo, w1t,
      jnp.asarray(g1, jnp.float32).reshape(-1, 1),
      jnp.asarray(bt1, jnp.float32).reshape(-1, 1),
      w2t,
      jnp.asarray(g2, jnp.float32).reshape(-1, 1),
      jnp.asarray(bt2, jnp.float32).reshape(-1, 1),
      mask)

    # Strip pad rows/cols of the flat layout and return NCHW.
    y = out_flat.reshape(Cout, N, Hp + 2, Wq)[:, :, :Hp, :Wp]
    return jnp.transpose(y, (1, 0, 2, 3))


def ref_downblock(x_nchw, params):
    """Pure-JAX reference (same semantics, bias kept) for correctness checking."""
    w1, b1, g1, bt1, w2, b2, g2, bt2 = params
    x = jnp.transpose(x_nchw, (0, 2, 3, 1)).astype(jnp.float32)
    pooled = jax.lax.reduce_window(x, -jnp.inf, jax.lax.max,
                                   (1, 2, 2, 1), (1, 2, 2, 1), 'VALID')

    def conv_bn_relu(h, w, b, g, bt):
        y = jax.lax.conv_general_dilated(
            h, w, (1, 1), 'SAME', dimension_numbers=('NHWC', 'HWIO', 'NHWC'))
        y = y + b
        mean = jnp.mean(y, axis=(0, 1, 2))
        var = jnp.mean((y - mean) ** 2, axis=(0, 1, 2))
        y = (y - mean) * jax.lax.rsqrt(var + _EPS) * g + bt
        return jnp.maximum(y, 0.0)

    y = conv_bn_relu(pooled, w1, b1, g1, bt1)
    y = conv_bn_relu(y, w2, b2, g2, bt2)
    return jnp.transpose(y, (0, 3, 1, 2))


if __name__ == "__main__":
    key = jax.random.PRNGKey(0)
    ks = jax.random.split(key, 9)

    N, Cin, H, W = 2, 4, 16, 16
    Cout = 8
    Cmid = Cout  # mid_channel=None -> mid_channel = out_channel

    x = jax.random.normal(ks[0], (N, Cin, H, W), jnp.float32)

    # deterministic synthetic parameters (conv weights in HWIO layout)
    w1 = 0.2 * jax.random.normal(ks[1], (3, 3, Cin, Cmid), jnp.float32)
    b1 = 0.1 * jax.random.normal(ks[2], (Cmid,), jnp.float32)
    g1 = 1.0 + 0.1 * jax.random.normal(ks[3], (Cmid,), jnp.float32)
    bt1 = 0.1 * jax.random.normal(ks[4], (Cmid,), jnp.float32)
    w2 = 0.2 * jax.random.normal(ks[5], (3, 3, Cmid, Cout), jnp.float32)
    b2 = 0.1 * jax.random.normal(ks[6], (Cout,), jnp.float32)
    g2 = 1.0 + 0.1 * jax.random.normal(ks[7], (Cout,), jnp.float32)
    bt2 = 0.1 * jax.random.normal(ks[8], (Cout,), jnp.float32)
    params = (w1, b1, g1, bt1, w2, b2, g2, bt2)

    out = jax.block_until_ready(down_block(x, params))
    ref = jax.block_until_ready(ref_downblock(x, params))

    assert out.shape == (N, Cout, H // 2, W // 2), out.shape
    np.testing.assert_allclose(np.asarray(out), np.asarray(ref),
                               atol=2e-4, rtol=2e-4)
    print("KERNEL_OK")
</pallas_src>

<mosaic_0001>
module attributes {stable_mosaic.version = 11 : i64} {
  func.func @kernel(%arg0: memref<4x32x8xf32, #tpu.memory_space<vmem>>, %arg1: memref<4x32x8xf32, #tpu.memory_space<vmem>>, %arg2: memref<8x36xf32, #tpu.memory_space<vmem>>, %arg3: memref<8x1xf32, #tpu.memory_space<vmem>>, %arg4: memref<8x1xf32, #tpu.memory_space<vmem>>, %arg5: memref<8x72xf32, #tpu.memory_space<vmem>>, %arg6: memref<8x1xf32, #tpu.memory_space<vmem>>, %arg7: memref<8x1xf32, #tpu.memory_space<vmem>>, %arg8: memref<1x178xf32, #tpu.memory_space<vmem>>, %arg9: memref<8x200xf32, #tpu.memory_space<vmem>>, %arg10: memref<4x200xf32, #tpu.memory_space<vmem>>, %arg11: memref<36x178xf32, #tpu.memory_space<vmem>>, %arg12: memref<8x200xf32, #tpu.memory_space<vmem>>, %arg13: memref<72x178xf32, #tpu.memory_space<vmem>>) attributes {dimension_semantics = [], scalar_prefetch = 0 : i64, scratch_operands = 4 : i64, tpu.core_type = #tpu.core_type<tc>} {
    %c0 = arith.constant 0 : index
    %c0_0 = arith.constant 0 : index
    %c0_1 = arith.constant 0 : index
    %0 = tpu.strided_load %arg0[%c0, %c0_0, %c0_1] {strides = array<i32: 1, 2, 1>} : memref<4x32x8xf32, #tpu.memory_space<vmem>>, vector<4x16x8xf32>
    %c0_2 = arith.constant 0 : index
    %c0_3 = arith.constant 0 : index
    %c0_4 = arith.constant 0 : index
    %1 = tpu.strided_load %arg1[%c0_2, %c0_3, %c0_4] {strides = array<i32: 1, 2, 1>} : memref<4x32x8xf32, #tpu.memory_space<vmem>>, vector<4x16x8xf32>
    %c0_5 = arith.constant 0 : index
    %c1 = arith.constant 1 : index
    %c0_6 = arith.constant 0 : index
    %2 = tpu.strided_load %arg0[%c0_5, %c1, %c0_6] {strides = array<i32: 1, 2, 1>} : memref<4x32x8xf32, #tpu.memory_space<vmem>>, vector<4x16x8xf32>
    %c0_7 = arith.constant 0 : index
    %c1_8 = arith.constant 1 : index
    %c0_9 = arith.constant 0 : index
    %3 = tpu.strided_load %arg1[%c0_7, %c1_8, %c0_9] {strides = array<i32: 1, 2, 1>} : memref<4x32x8xf32, #tpu.memory_space<vmem>>, vector<4x16x8xf32>
    %4 = arith.maximumf %0, %1 : vector<4x16x8xf32>
    %5 = arith.maximumf %2, %3 : vector<4x16x8xf32>
    %6 = arith.maximumf %4, %5 : vector<4x16x8xf32>
    %cst = arith.constant 0.000000e+00 : f32
    %7 = vector.broadcast %cst : f32 to vector<4x200xf32>
    %c0_10 = arith.constant 0 : index
    %c0_11 = arith.constant 0 : index
    %8 = vector.load %arg10[%c0_10, %c0_11] : memref<4x200xf32, #tpu.memory_space<vmem>>, vector<4x200xf32>
    tpu.vector_store %arg10[%c0_10, %c0_11], %7 {strides = array<i32>} : memref<4x200xf32, #tpu.memory_space<vmem>>, vector<4x200xf32>,
    %9 = vector.extract_strided_slice %6 {offsets = [0, 0, 0], sizes = [4, 1, 8], strides = [1, 1, 1]} : vector<4x16x8xf32> to vector<4x1x8xf32>
    %10 = vector.shape_cast %9 : vector<4x1x8xf32> to vector<4x8xf32>
    %c0_12 = arith.constant 0 : index
    %c11 = arith.constant 11 : index
    %11 = vector.load %arg10[%c0_12, %c11] : memref<4x200xf32, #tpu.memory_space<vmem>>, vector<4x8xf32>
    tpu.vector_store %arg10[%c0_12, %c11], %10 {strides = array<i32>} : memref<4x200xf32, #tpu.memory_space<vmem>>, vector<4x8xf32>,
    %12 = vector.extract_strided_slice %6 {offsets = [0, 1, 0], sizes = [4, 1, 8], strides = [1, 1, 1]} : vector<4x16x8xf32> to vector<4x1x8xf32>
    %13 = vector.shape_cast %12 : vector<4x1x8xf32> to vector<4x8xf32>
    %c0_13 = arith.constant 0 : index
    %c21 = arith.constant 21 : index
    %14 = vector.load %arg10[%c0_13, %c21] : memref<4x200xf32, #tpu.memory_space<vmem>>, vector<4x8xf32>
    tpu.vector_store %arg10[%c0_13, %c21], %13 {strides = array<i32>} : memref<4x200xf32, #tpu.memory_space<vmem>>, vector<4x8xf32>,
    %15 = vector.extract_strided_slice %6 {offsets = [0, 2, 0], sizes = [4, 1, 8], strides = [1, 1, 1]} : vector<4x16x8xf32> to vector<4x1x8xf32>
    %16 = vector.shape_cast %15 : vector<4x1x8xf32> to vector<4x8xf32>
    %c0_14 = arith.constant 0 : index
    %c31 = arith.constant 31 : index
    %17 = vector.load %arg10[%c0_14, %c31] : memref<4x200xf32, #tpu.memory_space<vmem>>, vector<4x8xf32>
    tpu.vector_store %arg10[%c0_14, %c31], %16 {strides = array<i32>} : memref<4x200xf32, #tpu.memory_space<vmem>>, vector<4x8xf32>,
    %18 = vector.extract_strided_slice %6 {offsets = [0, 3, 0], sizes = [4, 1, 8], strides = [1, 1, 1]} : vector<4x16x8xf32> to vector<4x1x8xf32>
    %19 = vector.shape_cast %18 : vector<4x1x8xf32> to vector<4x8xf32>
    %c0_15 = arith.constant 0 : index
    %c41 = arith.constant 41 : index
    %20 = vector.load %arg10[%c0_15, %c41] : memref<4x200xf32, #tpu.memory_space<vmem>>, vector<4x8xf32>
    tpu.vector_store %arg10[%c0_15, %c41], %19 {strides = array<i32>} : memref<4x200xf32, #tpu.memory_space<vmem>>, vector<4x8xf32>,
    %21 = vector.extract_strided_slice %6 {offsets = [0, 4, 0], sizes = [4, 1, 8], strides = [1, 1, 1]} : vector<4x16x8xf32> to vector<4x1x8xf32>
    %22 = vector.shape_cast %21 : vector<4x1x8xf32> to vector<4x8xf32>
    %c0_16 = arith.constant 0 : index
    %c51 = arith.constant 51 : index
    %23 = vector.load %arg10[%c0_16, %c51] : memref<4x200xf32, #tpu.memory_space<vmem>>, vector<4x8xf32>
    tpu.vector_store %arg10[%c0_16, %c51], %22 {strides = array<i32>} : memref<4x200xf32, #tpu.memory_space<vmem>>, vector<4x8xf32>,
    %24 = vector.extract_strided_slice %6 {offsets = [0, 5, 0], sizes = [4, 1, 8], strides = [1, 1, 1]} : vector<4x16x8xf32> to vector<4x1x8xf32>
    %25 = vector.shape_cast %24 : vector<4x1x8xf32> to vector<4x8xf32>
    %c0_17 = arith.constant 0 : index
    %c61 = arith.constant 61 : index
    %26 = vector.load %arg10[%c0_17, %c61] : memref<4x200xf32, #tpu.memory_space<vmem>>, vector<4x8xf32>
    tpu.vector_store %arg10[%c0_17, %c61], %25 {strides = array<i32>} : memref<4x200xf32, #tpu.memory_space<vmem>>, vector<4x8xf32>,
    %27 = vector.extract_strided_slice %6 {offsets = [0, 6, 0], sizes = [4, 1, 8], strides = [1, 1, 1]} : vector<4x16x8xf32> to vector<4x1x8xf32>
    %28 = vector.shape_cast %27 : vector<4x1x8xf32> to vector<4x8xf32>
    %c0_18 = arith.constant 0 : index
    %c71 = arith.constant 71 : index
    %29 = vector.load %arg10[%c0_18, %c71] : memref<4x200xf32, #tpu.memory_space<vmem>>, vector<4x8xf32>
    tpu.vector_store %arg10[%c0_18, %c71], %28 {strides = array<i32>} : memref<4x200xf32, #tpu.memory_space<vmem>>, vector<4x8xf32>,
    %30 = vector.extract_strided_slice %6 {offsets = [0, 7, 0], sizes = [4, 1, 8], strides = [1, 1, 1]} : vector<4x16x8xf32> to vector<4x1x8xf32>
    %31 = vector.shape_cast %30 : vector<4x1x8xf32> to vector<4x8xf32>
    %c0_19 = arith.constant 0 : index
    %c81 = arith.constant 81 : index
    %32 = vector.load %arg10[%c0_19, %c81] : memref<4x200xf32, #tpu.memory_space<vmem>>, vector<4x8xf32>
    tpu.vector_store %arg10[%c0_19, %c81], %31 {strides = array<i32>} : memref<4x200xf32, #tpu.memory_space<vmem>>, vector<4x8xf32>,
    %33 = vector.extract_strided_slice %6 {offsets = [0, 8, 0], sizes = [4, 1, 8], strides = [1, 1, 1]} : vector<4x16x8xf32> to vector<4x1x8xf32>
    %34 = vector.shape_cast %33 : vector<4x1x8xf32> to vector<4x8xf32>
    %c0_20 = arith.constant 0 : index
    %c111 = arith.constant 111 : index
    %35 = vector.load %arg10[%c0_20, %c111] : memref<4x200xf32, #tpu.memory_space<vmem>>, vector<4x8xf32>
    tpu.vector_store %arg10[%c0_20, %c111], %34 {strides = array<i32>} : memref<4x200xf32, #tpu.memory_space<vmem>>, vector<4x8xf32>,
    %36 = vector.extract_strided_slice %6 {offsets = [0, 9, 0], sizes = [4, 1, 8], strides = [1, 1, 1]} : vector<4x16x8xf32> to vector<4x1x8xf32>
    %37 = vector.shape_cast %36 : vector<4x1x8xf32> to vector<4x8xf32>
    %c0_21 = arith.constant 0 : index
    %c121 = arith.constant 121 : index
    %38 = vector.load %arg10[%c0_21, %c121] : memref<4x200xf32, #tpu.memory_space<vmem>>, vector<4x8xf32>
    tpu.vector_store %arg10[%c0_21, %c121], %37 {strides = array<i32>} : memref<4x200xf32, #tpu.memory_space<vmem>>, vector<4x8xf32>,
    %39 = vector.extract_strided_slice %6 {offsets = [0, 10, 0], sizes = [4, 1, 8], strides = [1, 1, 1]} : vector<4x16x8xf32> to vector<4x1x8xf32>
    %40 = vector.shape_cast %39 : vector<4x1x8xf32> to vector<4x8xf32>
    %c0_22 = arith.constant 0 : index
    %c131 = arith.constant 131 : index
    %41 = vector.load %arg10[%c0_22, %c131] : memref<4x200xf32, #tpu.memory_space<vmem>>, vector<4x8xf32>
    tpu.vector_store %arg10[%c0_22, %c131], %40 {strides = array<i32>} : memref<4x200xf32, #tpu.memory_space<vmem>>, vector<4x8xf32>,
    %42 = vector.extract_strided_slice %6 {offsets = [0, 11, 0], sizes = [4, 1, 8], strides = [1, 1, 1]} : vector<4x16x8xf32> to vector<4x1x8xf32>
    %43 = vector.shape_cast %42 : vector<4x1x8xf32> to vector<4x8xf32>
    %c0_23 = arith.constant 0 : index
    %c141 = arith.constant 141 : index
    %44 = vector.load %arg10[%c0_23, %c141] : memref<4x200xf32, #tpu.memory_space<vmem>>, vector<4x8xf32>
    tpu.vector_store %arg10[%c0_23, %c141], %43 {strides = array<i32>} : memref<4x200xf32, #tpu.memory_space<vmem>>, vector<4x8xf32>,
    %45 = vector.extract_strided_slice %6 {offsets = [0, 12, 0], sizes = [4, 1, 8], strides = [1, 1, 1]} : vector<4x16x8xf32> to vector<4x1x8xf32>
    %46 = vector.shape_cast %45 : vector<4x1x8xf32> to vector<4x8xf32>
    %c0_24 = arith.constant 0 : index
    %c151 = arith.constant 151 : index
    %47 = vector.load %arg10[%c0_24, %c151] : memref<4x200xf32, #tpu.memory_space<vmem>>, vector<4x8xf32>
    tpu.vector_store %arg10[%c0_24, %c151], %46 {strides = array<i32>} : memref<4x200xf32, #tpu.memory_space<vmem>>, vector<4x8xf32>,
    %48 = vector.extract_strided_slice %6 {offsets = [0, 13, 0], sizes = [4, 1, 8], strides = [1, 1, 1]} : vector<4x16x8xf32> to vector<4x1x8xf32>
    %49 = vector.shape_cast %48 : vector<4x1x8xf32> to vector<4x8xf32>
    %c0_25 = arith.constant 0 : index
    %c161 = arith.constant 161 : index
    %50 = vector.load %arg10[%c0_25, %c161] : memref<4x200xf32, #tpu.memory_space<vmem>>, vector<4x8xf32>
    tpu.vector_store %arg10[%c0_25, %c161], %49 {strides = array<i32>} : memref<4x200xf32, #tpu.memory_space<vmem>>, vector<4x8xf32>,
    %51 = vector.extract_strided_slice %6 {offsets = [0, 14, 0], sizes = [4, 1, 8], strides = [1, 1, 1]} : vector<4x16x8xf32> to vector<4x1x8xf32>
    %52 = vector.shape_cast %51 : vector<4x1x8xf32> to vector<4x8xf32>
    %c0_26 = arith.constant 0 : index
    %c171 = arith.constant 171 : index
    %53 = vector.load %arg10[%c0_26, %c171] : memref<4x200xf32, #tpu.memory_space<vmem>>, vector<4x8xf32>
    tpu.vector_store %arg10[%c0_26, %c171], %52 {strides = array<i32>} : memref<4x200xf32, #tpu.memory_space<vmem>>, vector<4x8xf32>,
    %54 = vector.extract_strided_slice %6 {offsets = [0, 15, 0], sizes = [4, 1, 8], strides = [1, 1, 1]} : vector<4x16x8xf32> to vector<4x1x8xf32>
    %55 = vector.shape_cast %54 : vector<4x1x8xf32> to vector<4x8xf32>
    %c0_27 = arith.constant 0 : index
    %c181 = arith.constant 181 : index
    %56 = vector.load %arg10[%c0_27, %c181] : memref<4x200xf32, #tpu.memory_space<vmem>>, vector<4x8xf32>
    tpu.vector_store %arg10[%c0_27, %c181], %55 {strides = array<i32>} : memref<4x200xf32, #tpu.memory_space<vmem>>, vector<4x8xf32>,
    %c0_28 = arith.constant 0 : index
    %c0_29 = arith.constant 0 : index
    %57 = vector.load %arg8[%c0_28, %c0_29] : memref<1x178xf32, #tpu.memory_space<vmem>>, vector<1x178xf32>
    %c0_30 = arith.constant 0 : index
    %c0_31 = arith.constant 0 : index
    %58 = vector.load %arg10[%c0_30, %c0_31] : memref<4x200xf32, #tpu.memory_space<vmem>>, vector<4x178xf32>
    %c0_32 = arith.constant 0 : index
    %c0_33 = arith.constant 0 : index
    %59 = vector.load %arg11[%c0_32, %c0_33] : memref<36x178xf32, #tpu.memory_space<vmem>>, vector<4x178xf32>
    tpu.vector_store %arg11[%c0_32, %c0_33], %58 {strides = array<i32>} : memref<36x178xf32, #tpu.memory_space<vmem>>, vector<4x178xf32>,
    %c0_34 = arith.constant 0 : index
    %c1_35 = arith.constant 1 : index
    %60 = vector.load %arg10[%c0_34, %c1_35] : memref<4x200xf32, #tpu.memory_space<vmem>>, vector<4x178xf32>
    %c4 = arith.constant 4 : index
    %c0_36 = arith.constant 0 : index
    %61 = vector.load %arg11[%c4, %c0_36] : memref<36x178xf32, #tpu.memory_space<vmem>>, vector<4x178xf32>
    tpu.vector_store %arg11[%c4, %c0_36], %60 {strides = array<i32>} : memref<36x178xf32, #tpu.memory_space<vmem>>, vector<4x178xf32>,
    %c0_37 = arith.constant 0 : index
    %c2 = arith.constant 2 : index
    %62 = vector.load %arg10[%c0_37, %c2] : memref<4x200xf32, #tpu.memory_space<vmem>>, vector<4x178xf32>
    %c8 = arith.constant 8 : index
    %c0_38 = arith.constant 0 : index
    %63 = vector.load %arg11[%c8, %c0_38] : memref<36x178xf32, #tpu.memory_space<vmem>>, vector<4x178xf32>
    tpu.vector_store %arg11[%c8, %c0_38], %62 {strides = array<i32>} : memref<36x178xf32, #tpu.memory_space<vmem>>, vector<4x178xf32>,
    %c0_39 = arith.constant 0 : index
    %c10 = arith.constant 10 : index
    %64 = vector.load %arg10[%c0_39, %c10] : memref<4x200xf32, #tpu.memory_space<vmem>>, vector<4x178xf32>
    %c12 = arith.constant 12 : index
    %c0_40 = arith.constant 0 : index
    %65 = vector.load %arg11[%c12, %c0_40] : memref<36x178xf32, #tpu.memory_space<vmem>>, vector<4x178xf32>
    tpu.vector_store %arg11[%c12, %c0_40], %64 {strides = array<i32>} : memref<36x178xf32, #tpu.memory_space<vmem>>, vector<4x178xf32>,
    %c0_41 = arith.constant 0 : index
    %c11_42 = arith.constant 11 : index
    %66 = vector.load %arg10[%c0_41, %c11_42] : memref<4x200xf32, #tpu.memory_space<vmem>>, vector<4x178xf32>
    %c16 = arith.constant 16 : index
    %c0_43 = arith.constant 0 : index
    %67 = vector.load %arg11[%c16, %c0_43] : memref<36x178xf32, #tpu.memory_space<vmem>>, vector<4x178xf32>
    tpu.vector_store %arg11[%c16, %c0_43], %66 {strides = array<i32>} : memref<36x178xf32, #tpu.memory_space<vmem>>, vector<4x178xf32>,
    %c0_44 = arith.constant 0 : index
    %c12_45 = arith.constant 12 : index
    %68 = vector.load %arg10[%c0_44, %c12_45] : memref<4x200xf32, #tpu.memory_space<vmem>>, vector<4x178xf32>
    %c20 = arith.constant 20 : index
    %c0_46 = arith.constant 0 : index
    %69 = vector.load %arg11[%c20, %c0_46] : memref<36x178xf32, #tpu.memory_space<vmem>>, vector<4x178xf32>
    tpu.vector_store %arg11[%c20, %c0_46], %68 {strides = array<i32>} : memref<36x178xf32, #tpu.memory_space<vmem>>, vector<4x178xf32>,
    %c0_47 = arith.constant 0 : index
    %c20_48 = arith.constant 20 : index
    %70 = vector.load %arg10[%c0_47, %c20_48] : memref<4x200xf32, #tpu.memory_space<vmem>>, vector<4x178xf32>
    %c24 = arith.constant 24 : index
    %c0_49 = arith.constant 0 : index
    %71 = vector.load %arg11[%c24, %c0_49] : memref<36x178xf32, #tpu.memory_space<vmem>>, vector<4x178xf32>
    tpu.vector_store %arg11[%c24, %c0_49], %70 {strides = array<i32>} : memref<36x178xf32, #tpu.memory_space<vmem>>, vector<4x178xf32>,
    %c0_50 = arith.constant 0 : index
    %c21_51 = arith.constant 21 : index
    %72 = vector.load %arg10[%c0_50, %c21_51] : memref<4x200xf32, #tpu.memory_space<vmem>>, vector<4x178xf32>
    %c28 = arith.constant 28 : index
    %c0_52 = arith.constant 0 : index
    %73 = vector.load %arg11[%c28, %c0_52] : memref<36x178xf32, #tpu.memory_space<vmem>>, vector<4x178xf32>
    tpu.vector_store %arg11[%c28, %c0_52], %72 {strides = array<i32>} : memref<36x178xf32, #tpu.memory_space<vmem>>, vector<4x178xf32>,
    %c0_53 = arith.constant 0 : index
    %c22 = arith.constant 22 : index
    %74 = vector.load %arg10[%c0_53, %c22] : memref<4x200xf32, #tpu.memory_space<vmem>>, vector<4x178xf32>
    %c32 = arith.constant 32 : index
    %c0_54 = arith.constant 0 : index
    %75 = vector.load %arg11[%c32, %c0_54] : memref<36x178xf32, #tpu.memory_space<vmem>>, vector<4x178xf32>
    tpu.vector_store %arg11[%c32, %c0_54], %74 {strides = array<i32>} : memref<36x178xf32, #tpu.memory_space<vmem>>, vector<4x178xf32>,
    %c0_55 = arith.constant 0 : index
    %c0_56 = arith.constant 0 : index
    %76 = vector.load %arg2[%c0_55, %c0_56] : memref<8x36xf32, #tpu.memory_space<vmem>>, vector<8x36xf32>
    %c0_57 = arith.constant 0 : index
    %c0_58 = arith.constant 0 : index
    %77 = vector.load %arg11[%c0_57, %c0_58] : memref<36x178xf32, #tpu.memory_space<vmem>>, vector<36x178xf32>
    %cst_59 = arith.constant dense<0.000000e+00> : vector<8x178xf32>
    %78 = tpu.matmul %76, %77, %cst_59 {dimension_numbers = #tpu.dot_dimension_numbers<[1], [0], [0], [1], [0, 0, 1, 1], [], []>} : vector<8x36xf32>, vector<36x178xf32>, vector<8x178xf32> -> vector<8x178xf32>
    %79 = vector.broadcast %57 : vector<1x178xf32> to vector<8x178xf32>
    %80 = arith.mulf %78, %79 : vector<8x178xf32>
    %cst_60 = arith.constant dense<0.000000e+00> : vector<8xf32>
    %81 = vector.multi_reduction <add>, %80, %cst_60 [1] : vector<8x178xf32> to vector<8xf32>
    %82 = vector.shape_cast %81 : vector<8xf32> to vector<8x1xf32>
    %83 = arith.mulf %80, %78 : vector<8x178xf32>
    %cst_61 = arith.constant dense<0.000000e+00> : vector<8xf32>
    %84 = vector.multi_reduction <add>, %83, %cst_61 [1] : vector<8x178xf32> to vector<8xf32>
    %85 = vector.shape_cast %84 : vector<8xf32> to vector<8x1xf32>
    %cst_62 = arith.constant 7.812500e-03 : f32
    %86 = vector.broadcast %cst_62 : f32 to vector<8x1xf32>
    %87 = arith.mulf %82, %86 : vector<8x1xf32>
    %cst_63 = arith.constant 7.812500e-03 : f32
    %88 = vector.broadcast %cst_63 : f32 to vector<8x1xf32>
    %89 = arith.mulf %85, %88 : vector<8x1xf32>
    %90 = arith.mulf %87, %87 : vector<8x1xf32>
    %91 = arith.subf %89, %90 : vector<8x1xf32>
    %c0_64 = arith.constant 0 : index
    %c0_65 = arith.constant 0 : index
    %92 = vector.load %arg3[%c0_64, %c0_65] : memref<8x1xf32, #tpu.memory_space<vmem>>, vector<8x1xf32>
    %cst_66 = arith.constant 9.99999974E-6 : f32
    %93 = vector.broadcast %cst_66 : f32 to vector<8x1xf32>
    %94 = arith.addf %91, %93 : vector<8x1xf32>
    %95 = math.rsqrt %94 : vector<8x1xf32>
    %96 = arith.mulf %92, %95 : vector<8x1xf32>
    %c0_67 = arith.constant 0 : index
    %c0_68 = arith.constant 0 : index
    %97 = vector.load %arg4[%c0_67, %c0_68] : memref<8x1xf32, #tpu.memory_space<vmem>>, vector<8x1xf32>
    %98 = arith.mulf %87, %96 : vector<8x1xf32>
    %99 = arith.subf %97, %98 : vector<8x1xf32>
    %100 = vector.broadcast %96 : vector<8x1xf32> to vector<8x178xf32>
    %101 = arith.mulf %78, %100 : vector<8x178xf32>
    %102 = vector.broadcast %99 : vector<8x1xf32> to vector<8x178xf32>
    %103 = arith.addf %101, %102 : vector<8x178xf32>
    %cst_69 = arith.constant 0.000000e+00 : f32
    %104 = vector.broadcast %cst_69 : f32 to vector<8x178xf32>
    %105 = arith.maximumf %103, %104 : vector<8x178xf32>
    %106 = vector.broadcast %57 : vector<1x178xf32> to vector<8x178xf32>
    %107 = arith.mulf %105, %106 : vector<8x178xf32>
    %cst_70 = arith.constant 0.000000e+00 : f32
    %108 = vector.broadcast %cst_70 : f32 to vector<8x200xf32>
    %c0_71 = arith.constant 0 : index
    %c0_72 = arith.constant 0 : index
    %109 = vector.load %arg12[%c0_71, %c0_72] : memref<8x200xf32, #tpu.memory_space<vmem>>, vector<8x200xf32>
    tpu.vector_store %arg12[%c0_71, %c0_72], %108 {strides = array<i32>} : memref<8x200xf32, #tpu.memory_space<vmem>>, vector<8x200xf32>,
    %c0_73 = arith.constant 0 : index
    %c11_74 = arith.constant 11 : index
    %110 = vector.load %arg12[%c0_73, %c11_74] : memref<8x200xf32, #tpu.memory_space<vmem>>, vector<8x178xf32>
    tpu.vector_store %arg12[%c0_73, %c11_74], %107 {strides = array<i32>} : memref<8x200xf32, #tpu.memory_space<vmem>>, vector<8x178xf32>,
    %c0_75 = arith.constant 0 : index
    %c0_76 = arith.constant 0 : index
    %111 = vector.load %arg12[%c0_75, %c0_76] : memref<8x200xf32, #tpu.memory_space<vmem>>, vector<8x178xf32>
    %c0_77 = arith.constant 0 : index
    %c0_78 = arith.constant 0 : index
    %112 = vector.load %arg13[%c0_77, %c0_78] : memref<72x178xf32, #tpu.memory_space<vmem>>, vector<8x178xf32>
    tpu.vector_store %arg13[%c0_77, %c0_78], %111 {strides = array<i32>} : memref<72x178xf32, #tpu.memory_space<vmem>>, vector<8x178xf32>,
    %c0_79 = arith.constant 0 : index
    %c1_80 = arith.constant 1 : index
    %113 = vector.load %arg12[%c0_79, %c1_80] : memref<8x200xf32, #tpu.memory_space<vmem>>, vector<8x178xf32>
    %c8_81 = arith.constant 8 : index
    %c0_82 = arith.constant 0 : index
    %114 = vector.load %arg13[%c8_81, %c0_82] : memref<72x178xf32, #tpu.memory_space<vmem>>, vector<8x178xf32>
    tpu.vector_store %arg13[%c8_81, %c0_82], %113 {strides = array<i32>} : memref<72x178xf32, #tpu.memory_space<vmem>>, vector<8x178xf32>,
    %c0_83 = arith.constant 0 : index
    %c2_84 = arith.constant 2 : index
    %115 = vector.load %arg12[%c0_83, %c2_84] : memref<8x200xf32, #tpu.memory_space<vmem>>, vector<8x178xf32>
    %c16_85 = arith.constant 16 : index
    %c0_86 = arith.constant 0 : index
    %116 = vector.load %arg13[%c16_85, %c0_86] : memref<72x178xf32, #tpu.memory_space<vmem>>, vector<8x178xf32>
    tpu.vector_store %arg13[%c16_85, %c0_86], %115 {strides = array<i32>} : memref<72x178xf32, #tpu.memory_space<vmem>>, vector<8x178xf32>,
    %c0_87 = arith.constant 0 : index
    %c10_88 = arith.constant 10 : index
    %117 = vector.load %arg12[%c0_87, %c10_88] : memref<8x200xf32, #tpu.memory_space<vmem>>, vector<8x178xf32>
    %c24_89 = arith.constant 24 : index
    %c0_90 = arith.constant 0 : index
    %118 = vector.load %arg13[%c24_89, %c0_90] : memref<72x178xf32, #tpu.memory_space<vmem>>, vector<8x178xf32>
    tpu.vector_store %arg13[%c24_89, %c0_90], %117 {strides = array<i32>} : memref<72x178xf32, #tpu.memory_space<vmem>>, vector<8x178xf32>,
    %c0_91 = arith.constant 0 : index
    %c11_92 = arith.constant 11 : index
    %119 = vector.load %arg12[%c0_91, %c11_92] : memref<8x200xf32, #tpu.memory_space<vmem>>, vector<8x178xf32>
    %c32_93 = arith.constant 32 : index
    %c0_94 = arith.constant 0 : index
    %120 = vector.load %arg13[%c32_93, %c0_94] : memref<72x178xf32, #tpu.memory_space<vmem>>, vector<8x178xf32>
    tpu.vector_store %arg13[%c32_93, %c0_94], %119 {strides = array<i32>} : memref<72x178xf32, #tpu.memory_space<vmem>>, vector<8x178xf32>,
    %c0_95 = arith.constant 0 : index
    %c12_96 = arith.constant 12 : index
    %121 = vector.load %arg12[%c0_95, %c12_96] : memref<8x200xf32, #tpu.memory_space<vmem>>, vector<8x178xf32>
    %c40 = arith.constant 40 : index
    %c0_97 = arith.constant 0 : index
    %122 = vector.load %arg13[%c40, %c0_97] : memref<72x178xf32, #tpu.memory_space<vmem>>, vector<8x178xf32>
    tpu.vector_store %arg13[%c40, %c0_97], %121 {strides = array<i32>} : memref<72x178xf32, #tpu.memory_space<vmem>>, vector<8x178xf32>,
    %c0_98 = arith.constant 0 : index
    %c20_99 = arith.constant 20 : index
    %123 = vector.load %arg12[%c0_98, %c20_99] : memref<8x200xf32, #tpu.memory_space<vmem>>, vector<8x178xf32>
    %c48 = arith.constant 48 : index
    %c0_100 = arith.constant 0 : index
    %124 = vector.load %arg13[%c48, %c0_100] : memref<72x178xf32, #tpu.memory_space<vmem>>, vector<8x178xf32>
    tpu.vector_store %arg13[%c48, %c0_100], %123 {strides = array<i32>} : memref<72x178xf32, #tpu.memory_space<vmem>>, vector<8x178xf32>,
    %c0_101 = arith.constant 0 : index
    %c21_102 = arith.constant 21 : index
    %125 = vector.load %arg12[%c0_101, %c21_102] : memref<8x200xf32, #tpu.memory_space<vmem>>, vector<8x178xf32>
    %c56 = arith.constant 56 : index
    %c0_103 = arith.constant 0 : index
    %126 = vector.load %arg13[%c56, %c0_103] : memref<72x178xf32, #tpu.memory_space<vmem>>, vector<8x178xf32>
    tpu.vector_store %arg13[%c56, %c0_103], %125 {strides = array<i32>} : memref<72x178xf32, #tpu.memory_space<vmem>>, vector<8x178xf32>,
    %c0_104 = arith.constant 0 : index
    %c22_105 = arith.constant 22 : index
    %127 = vector.load %arg12[%c0_104, %c22_105] : memref<8x200xf32, #tpu.memory_space<vmem>>, vector<8x178xf32>
    %c64 = arith.constant 64 : index
    %c0_106 = arith.constant 0 : index
    %128 = vector.load %arg13[%c64, %c0_106] : memref<72x178xf32, #tpu.memory_space<vmem>>, vector<8x178xf32>
    tpu.vector_store %arg13[%c64, %c0_106], %127 {strides = array<i32>} : memref<72x178xf32, #tpu.memory_space<vmem>>, vector<8x178xf32>,
    %c0_107 = arith.constant 0 : index
    %c0_108 = arith.constant 0 : index
    %129 = vector.load %arg5[%c0_107, %c0_108] : memref<8x72xf32, #tpu.memory_space<vmem>>, vector<8x72xf32>
    %c0_109 = arith.constant 0 : index
    %c0_110 = arith.constant 0 : index
    %130 = vector.load %arg13[%c0_109, %c0_110] : memref<72x178xf32, #tpu.memory_space<vmem>>, vector<72x178xf32>
    %cst_111 = arith.constant dense<0.000000e+00> : vector<8x178xf32>
    %131 = tpu.matmul %129, %130, %cst_111 {dimension_numbers = #tpu.dot_dimension_numbers<[1], [0], [0], [1], [0, 0, 1, 1], [], []>} : vector<8x72xf32>, vector<72x178xf32>, vector<8x178xf32> -> vector<8x178xf32>
    %132 = vector.broadcast %57 : vector<1x178xf32> to vector<8x178xf32>
    %133 = arith.mulf %131, %132 : vector<8x178xf32>
    %cst_112 = arith.constant dense<0.000000e+00> : vector<8xf32>
    %134 = vector.multi_reduction <add>, %133, %cst_112 [1] : vector<8x178xf32> to vector<8xf32>
    %135 = vector.shape_cast %134 : vector<8xf32> to vector<8x1xf32>
    %136 = arith.mulf %133, %131 : vector<8x178xf32>
    %cst_113 = arith.constant dense<0.000000e+00> : vector<8xf32>
    %137 = vector.multi_reduction <add>, %136, %cst_113 [1] : vector<8x178xf32> to vector<8xf32>
    %138 = vector.shape_cast %137 : vector<8xf32> to vector<8x1xf32>
    %cst_114 = arith.constant 7.812500e-03 : f32
    %139 = vector.broadcast %cst_114 : f32 to vector<8x1xf32>
    %140 = arith.mulf %135, %139 : vector<8x1xf32>
    %cst_115 = arith.constant 7.812500e-03 : f32
    %141 = vector.broadcast %cst_115 : f32 to vector<8x1xf32>
    %142 = arith.mulf %138, %141 : vector<8x1xf32>
    %143 = arith.mulf %140, %140 : vector<8x1xf32>
    %144 = arith.subf %142, %143 : vector<8x1xf32>
    %c0_116 = arith.constant 0 : index
    %c0_117 = arith.constant 0 : index
    %145 = vector.load %arg6[%c0_116, %c0_117] : memref<8x1xf32, #tpu.memory_space<vmem>>, vector<8x1xf32>
    %cst_118 = arith.constant 9.99999974E-6 : f32
    %146 = vector.broadcast %cst_118 : f32 to vector<8x1xf32>
    %147 = arith.addf %144, %146 : vector<8x1xf32>
    %148 = math.rsqrt %147 : vector<8x1xf32>
    %149 = arith.mulf %145, %148 : vector<8x1xf32>
    %c0_119 = arith.constant 0 : index
    %c0_120 = arith.constant 0 : index
    %150 = vector.load %arg7[%c0_119, %c0_120] : memref<8x1xf32, #tpu.memory_space<vmem>>, vector<8x1xf32>
    %151 = arith.mulf %140, %149 : vector<8x1xf32>
    %152 = arith.subf %150, %151 : vector<8x1xf32>
    %153 = vector.broadcast %149 : vector<8x1xf32> to vector<8x178xf32>
    %154 = arith.mulf %131, %153 : vector<8x178xf32>
    %155 = vector.broadcast %152 : vector<8x1xf32> to vector<8x178xf32>
    %156 = arith.addf %154, %155 : vector<8x178xf32>
    %cst_121 = arith.constant 0.000000e+00 : f32
    %157 = vector.broadcast %cst_121 : f32 to vector<8x178xf32>
    %158 = arith.maximumf %156, %157 : vector<8x178xf32>
    %c0_122 = arith.constant 0 : index
    %c0_123 = arith.constant 0 : index
    %159 = vector.load %arg9[%c0_122, %c0_123] : memref<8x200xf32, #tpu.memory_space<vmem>>, vector<8x178xf32>
    tpu.vector_store %arg9[%c0_122, %c0_123], %158 {strides = array<i32>} : memref<8x200xf32, #tpu.memory_space<vmem>>, vector<8x178xf32>,
    %cst_124 = arith.constant 0.000000e+00 : f32
    %160 = vector.broadcast %cst_124 : f32 to vector<8x22xf32>
    %c0_125 = arith.constant 0 : index
    %c178 = arith.constant 178 : index
    %161 = vector.load %arg9[%c0_125, %c178] : memref<8x200xf32, #tpu.memory_space<vmem>>, vector<8x22xf32>
    tpu.vector_store %arg9[%c0_125, %c178], %160 {strides = array<i32>} : memref<8x200xf32, #tpu.memory_space<vmem>>, vector<8x22xf32>,
    return
  }
}

</mosaic_0001>

<bundles_post_ra>
// kernel: tpu_custom_call.1
= control target key start
LH: loop header
LB: loop body
LE: loop exit
PB: predicated region body
PF: predicated region fallthrough
CT: control target
= control target key end

     0   :  { %vm128_vm0 = vcmask 1041409   ;;  %vm130_vm1 = vcmask 1045509   ;;  %vm133_vm2 = vcmask 1042434   ;;  %vm135_vm3 = vcmask 1046534   ;;  %s1505_s0 = inlined_call_operand.vmem [shape: f32[4,32,8], index: 0, kind: input, shape index: {}]   ;;  %s1506_s1 = inlined_call_operand.vmem [shape: f32[4,32,8], index: 1, kind: input, shape index: {}]   ;;  %s1507_s2 = inlined_call_operand.vmem [shape: f32[8,36], index: 2, kind: input, shape index: {}]   ;;  %s1508_s3 = inlined_call_operand.vmem [shape: f32[8,1], index: 3, kind: input, shape index: {}]   ;;  %s1509_s4 = inlined_call_operand.vmem [shape: f32[8,1], index: 4, kind: input, shape index: {}]   ;;  %s1510_s5 = inlined_call_operand.vmem [shape: f32[8,72], index: 5, kind: input, shape index: {}]   ;;  %s1511_s6 = inlined_call_operand.vmem [shape: f32[8,1], index: 6, kind: input, shape index: {}]   ;;  %s1512_s7 = inlined_call_operand.vmem [shape: f32[8,1], index: 7, kind: input, shape index: {}]   ;;  %s1513_s8 = inlined_call_operand.vmem [shape: f32[1,178], index: 8, kind: input, shape index: {}]   ;;  %s1514_s9 = inlined_call_operand.hbm [shape: f32[8,200], index: 9, kind: output, shape index: {}]  }
   0x1   :  { %v33_v0 = vld [vmem:[%s1505_s0] ss:$2 sm:$0xff]  ;;  %v921_v8 = vld [vmem:[%s1505_s0 + $0x1] ss:$2 sm:$0xff]  ;;  %vm138_vm4 = vcmask 1043459   ;;  %vm140_vm5 = vcmask 1047559  }
   0x2   :  { %v908_v1 = vld [vmem:[%s1505_s0 + $0x20] ss:$2 sm:$0xff]  ;;  %v923_v9 = vld [vmem:[%s1505_s0 + $0x21] ss:$2 sm:$0xff]  ;;  %v907_v44 = vld [vmem:[%s1505_s0 + $0x10] ss:$2 sm:$0xff] }
   0x3   :  { %v910_v2 = vld [vmem:[%s1505_s0 + $0x40] ss:$2 sm:$0xff]  ;;  %v925_v10 = vld [vmem:[%s1505_s0 + $0x41] ss:$2 sm:$0xff]  ;;  %v909_v45 = vld [vmem:[%s1505_s0 + $0x30] ss:$2 sm:$0xff] }
   0x4   :  { %v912_v3 = vld [vmem:[%s1505_s0 + $0x60] ss:$2 sm:$0xff]  ;;  %v927_v11 = vld [vmem:[%s1505_s0 + $0x61] ss:$2 sm:$0xff]  ;;  %v914_v46 = vld [vmem:[%s1506_s1 + $0x10] ss:$2 sm:$0xff] }
   0x5   :  { %v48_v4 = vld [vmem:[%s1506_s1] ss:$2 sm:$0xff]  ;;  %v929_v15 = vld [vmem:[%s1506_s1 + $0x1] ss:$2 sm:$0xff]  ;;  %v911_v51 = vld [vmem:[%s1505_s0 + $0x50] ss:$2 sm:$0xff] }
   0x6   :  { %v915_v5 = vld [vmem:[%s1506_s1 + $0x20] ss:$2 sm:$0xff]  ;;  %v95_v12 = vmax.f32 %v33_v0, %v48_v4  ;;  %v931_v16 = vld [vmem:[%s1506_s1 + $0x21] ss:$2 sm:$0xff]  ;;  %v103_v20 = vmax.f32 %v921_v8, %v929_v15  ;;  %v913_v52 = vld [vmem:[%s1505_s0 + $0x70] ss:$2 sm:$0xff] }
   0x7   :  { %v917_v6 = vld [vmem:[%s1506_s1 + $0x40] ss:$2 sm:$0xff]  ;;  %v97_v13 = vmax.f32 %v908_v1, %v915_v5  ;;  %v933_v17 = vld [vmem:[%s1506_s1 + $0x41] ss:$2 sm:$0xff]  ;;  %v105_v21 = vmax.f32 %v923_v9, %v931_v16  ;;  %v916_v53 = vld [vmem:[%s1506_s1 + $0x30] ss:$2 sm:$0xff] }
   0x8   :  { %v919_v7 = vld [vmem:[%s1506_s1 + $0x60] ss:$2 sm:$0xff]  ;;  %v99_v14 = vmax.f32 %v910_v2, %v917_v6  ;;  %v935_v19 = vld [vmem:[%s1506_s1 + $0x61] ss:$2 sm:$0xff]  ;;  %v107_v22 = vmax.f32 %v925_v10, %v933_v17  ;;  %v1149_v24 = vmax.f32 %v95_v12, %v103_v20  ;;  %v918_v54 = vld [vmem:[%s1506_s1 + $0x50] ss:$2 sm:$0xff] }
   0x9   :  { %v101_v18 = vmax.f32 %v912_v3, %v919_v7  ;;  %v109_v23 = vmax.f32 %v927_v11, %v935_v19  ;;  %v1151_v25 = vmax.f32 %v97_v13, %v105_v21  ;;  %v920_v55 = vld [vmem:[%s1506_s1 + $0x70] ss:$2 sm:$0xff]  ;;  %v922_v60 = vld [vmem:[%s1505_s0 + $0x11] ss:$2 sm:$0xff] }
   0xa   :  { %v1153_v26 = vmax.f32 %v99_v14, %v107_v22  ;;  %v161_v28 = vrot.slane %v1149_v24, 2  ;;  %v175_v34 = vrot.slane %v1149_v24, 3  ;;  %v147_v39 = vrot.slane %v1149_v24, 1  ;;  %v924_v61 = vld [vmem:[%s1505_s0 + $0x31] ss:$2 sm:$0xff] }
   0xb   :  { %v1155_v27 = vmax.f32 %v101_v18, %v109_v23  ;;  %v162_v29 = vrot.slane %v1151_v25, 1  ;;  %v127_v30 = vrot.slane %v1151_v25, 7  ;;  %v176_v35 = vrot.slane %v1151_v25, 2  ;;  %v926_v62 = vld [vmem:[%s1505_s0 + $0x51] ss:$2 sm:$0xff] }
   0xc   :  { %v132_v31 = vrot.slane %v1153_v26, 6  ;;  %v179_v38 = vrot.slane %v1153_v26, 1  ;;  %v150_v43 = vrot.slane %v1153_v26, 7  ;;  %v148_v50 = vsel %vm128_vm0, %v1151_v25, %v147_v39  ;;  %v930_v3 = vld [vmem:[%s1506_s1 + $0x11] ss:$2 sm:$0xff] }
   0xd   :  { %v167_v32 = vrot.slane %v1155_v27, 7  ;;  %v137_v33 = vrot.slane %v1155_v27, 5  ;;  %v163_v36 = vsel %vm128_vm0, %v162_v29, %v161_v28  ;;  %v129_v37 = vsel %vm128_vm0, %v127_v30, %v1149_v24  ;;  %v932_v4 = vld [vmem:[%s1506_s1 + $0x31] ss:$2 sm:$0xff] }
   0xe   :  { %v164_v40 = vsel %vm130_vm1, %v162_v29, %v163_v36  ;;  %v131_v41 = vsel %vm130_vm1, %v127_v30, %v129_v37  ;;  %v177_v42 = vsel %vm128_vm0, %v176_v35, %v175_v34  ;;  %v149_v59 = vsel %vm130_vm1, %v1151_v25, %v148_v50 }
   0xf   :  { %v165_v47 = vsel %vm133_vm2, %v1153_v26, %v164_v40  ;;  %v134_v48 = vsel %vm133_vm2, %v132_v31, %v131_v41  ;;  %v178_v49 = vsel %vm130_vm1, %v176_v35, %v177_v42  ;;  %v151_v2 = vsel %vm133_vm2, %v150_v43, %v149_v59 }
  0x10   :  { %v166_v56 = vsel %vm135_vm3, %v1153_v26, %v165_v47  ;;  %v136_v57 = vsel %vm135_vm3, %v132_v31, %v134_v48  ;;  %v180_v58 = vsel %vm133_vm2, %v179_v38, %v178_v49 }
  0x11   :  { %v168_v63 = vsel %vm138_vm4, %v167_v32, %v166_v56  ;;  %v139_v0 = vsel %vm138_vm4, %v137_v33, %v136_v57  ;;  %v181_v1 = vsel %vm135_vm3, %v179_v38, %v180_v58 }
  0x12   :  { %14 = vsyncpa [#allocation7], 0  ;;  %v169_v5 = vsel %vm140_vm5, %v167_v32, %v168_v63  ;;  %v141_v6 = vsel %vm140_vm5, %v137_v33, %v139_v0  ;;  %v182_v7 = vsel %vm138_vm4, %v1155_v27, %v181_v1  ;;  %v152_v8 = vsel %vm135_vm3, %v150_v43, %v151_v2  ;;  %v928_v9 = vld [vmem:[%s1505_s0 + $0x71] ss:$2 sm:$0xff]  ;;  %s1024_s10 = smov 31   ;;  %s1025_s11 = smov 11  }
  0x13   :  { %v934_v10 = vld [vmem:[%s1506_s1 + $0x51] ss:$2 sm:$0xff]  ;;  %170 = vrot.lane.b32.xlu1 %v169_v5, %s1024_s10  ;;  %142 = vrot.lane.b32.xlu0 %v141_v6, %s1025_s11  ;;  %v183_v12 = vsel %vm140_vm5, %v1155_v27, %v182_v7  ;;  %v153_v13 = vrot.slane %v1155_v27, 6  ;;  %v96_v14 = vmax.f32 %v907_v44, %v914_v46  ;;  %v98_v15 = vmax.f32 %v909_v45, %v916_v53  ;;  %s1026_s0 = smov 41   ;;  %s1028_s12 = smov 121  }
  0x14   :  { %v936_v11 = vld [vmem:[%s1506_s1 + $0x71] ss:$2 sm:$0xff]  ;;  %v100_v16 = vmax.f32 %v911_v51, %v918_v54  ;;  %v102_v17 = vmax.f32 %v913_v52, %v920_v55  ;;  %v104_v18 = vmax.f32 %v922_v60, %v930_v3  ;;  %v106_v19 = vmax.f32 %v924_v61, %v932_v4  ;;  %s1027_s1 = smov 21   ;;  %s1029_s13 = smov 51  }
  0x15   :  { %v154_v20 = vsel %vm138_vm4, %v153_v13, %v152_v8  ;;  %v108_v21 = vmax.f32 %v926_v62, %v934_v10  ;;  %v110_v22 = vmax.f32 %v928_v9, %v936_v11  ;;  %v189_v23 = vcombine.high %v1149_v24, %v1149_v24  ;;  %s1030_s14 = smov 61   ;;  %s1031_s15 = smov 71  }
  0x16   :  { %v155_v28 = vsel %vm140_vm5, %v153_v13, %v154_v20  ;;  %v1251_v29 = vmax.f32 %v96_v14, %v104_v18  ;;  %v1253_v30 = vmax.f32 %v98_v15, %v106_v19  ;;  %v190_v31 = vcombine.high %v1151_v25, %v1151_v25  ;;  %s1032_s16 = smov 81   ;;  %s1033_s17 = smov 111  }
  0x17   :  { %184 = vrot.lane.b32.xlu1 %v183_v12, %s1026_s0  ;;  %156 = vrot.lane.b32.xlu0 %v155_v28, %s1027_s1  ;;  %v1257_v32 = vmax.f32 %v100_v16, %v108_v21  ;;  %v1259_v33 = vmax.f32 %v102_v17, %v110_v22  ;;  %v1263_v24 = vcombine.high %v1153_v26, %v1153_v26  ;;  %v207_v34 = vrot.slane %v189_v23, 1  ;;  %s1034_s18 = smov 3   ;;  %s1035_s19 = smov 13  }
  0x18   :  { %v267_v35 = vrot.slane %v1251_v29, 1  ;;  %v1268_v36 = vcombine.high %v1155_v27, %v1155_v27  ;;  %v193_v25 = vrot.slane %v190_v31, 7  ;;  %v221_v37 = vrot.slane %v189_v23, 2  ;;  %s1036_s20 = smov 33   ;;  %s1037_s21 = smov 23  }
  0x19   :  { %v270_v38 = vrot.slane %v1257_v32, 7  ;;  %v273_v39 = vrot.slane %v1259_v33, 6  ;;  %v196_v40 = vrot.slane %v1263_v24, 6  ;;  %v208_v41 = vsel %vm128_vm0, %v190_v31, %v207_v34  ;;  %s1039_s22 = smov 53   ;;  %s1040_s23 = smov 43  }
  0x1a   :  { %v268_v26 = vsel %vm128_vm0, %v1253_v30, %v267_v35  ;;  %v194_v42 = vsel %vm128_vm0, %v193_v25, %v189_v23  ;;  %v199_v43 = vrot.slane %v1268_v36, 5  ;;  %v209_v27 = vsel %vm130_vm1, %v190_v31, %v208_v41  ;;  %s1041_s24 = smov 126   ;;  %s1042_s25 = smov 127  }
  0x1b   :  { %v269_v44 = vsel %vm130_vm1, %v1253_v30, %v268_v26  ;;  %v195_v45 = vsel %vm130_vm1, %v193_v25, %v194_v42  ;;  %v210_v46 = vrot.slane %v1263_v24, 7  ;;  %v213_v47 = vrot.slane %v1268_v36, 6  ;;  %s1043_s26 = smov 117   ;;  %s1044_s27 = smov 118  }
  0x1c   :  { %v271_v48 = vsel %vm133_vm2, %v270_v38, %v269_v44  ;;  %v197_v49 = vsel %vm133_vm2, %v196_v40, %v195_v45  ;;  %v222_v50 = vrot.slane %v190_v31, 1  ;;  %v227_v51 = vrot.slane %v1268_v36, 7  ;;  %s1045_s28 = smov 108   ;;  %s1046_s29 = smov 116  }
  0x1d   :  { %v272_v52 = vsel %vm135_vm3, %v270_v38, %v271_v48  ;;  %v198_v53 = vsel %vm135_vm3, %v196_v40, %v197_v49  ;;  %v211_v54 = vsel %vm133_vm2, %v210_v46, %v209_v27  ;;  %v235_v55 = vrot.slane %v189_v23, 3  ;;  %s1047_s30 = smov 107   ;;  %s1048_s10 = smov 106  }
  0x1e   :  { %v274_v56 = vsel %vm138_vm4, %v273_v39, %v272_v52  ;;  %v200_v57 = vsel %vm138_vm4, %v199_v43, %v198_v53  ;;  %v212_v58 = vsel %vm135_vm3, %v210_v46, %v211_v54  ;;  %v223_v59 = vsel %vm128_vm0, %v222_v50, %v221_v37 }
  0x1f   :  { %v275_v60 = vsel %vm140_vm5, %v273_v39, %v274_v56  ;;  %v201_v61 = vsel %vm140_vm5, %v199_v43, %v200_v57  ;;  %v214_v62 = vsel %vm138_vm4, %v213_v47, %v212_v58  ;;  %v224_v63 = vsel %vm130_vm1, %v222_v50, %v223_v59 }
  0x20   :  { %276 = vrot.lane.b32.xlu1 %v275_v60, %s1028_s12  ;;  %202 = vrot.lane.b32.xlu0 %v201_v61, %s1029_s13  ;;  %v215_v0 = vsel %vm140_vm5, %v213_v47, %v214_v62  ;;  %v225_v1 = vsel %vm133_vm2, %v1263_v24, %v224_v63  ;;  %v236_v2 = vrot.slane %v190_v31, 2  ;;  %v239_v3 = vrot.slane %v1263_v24, 1 }
  0x21   :  { %v226_v4 = vsel %vm135_vm3, %v1263_v24, %v225_v1  ;;  %v253_v5 = vrot.slane %v1253_v30, 7  ;;  %v256_v6 = vrot.slane %v1257_v32, 6  ;;  %v259_v7 = vrot.slane %v1259_v33, 5 }
  0x22   :  { %v228_v8 = vsel %vm138_vm4, %v227_v51, %v226_v4  ;;  %v237_v9 = vsel %vm128_vm0, %v236_v2, %v235_v55  ;;  %v286_v10 = vrot.slane %v1251_v29, 2  ;;  %v287_v11 = vrot.slane %v1253_v30, 1 }
  0x23   :  { %v229_v12 = vsel %vm140_vm5, %v227_v51, %v228_v8  ;;  %v238_v13 = vsel %vm130_vm1, %v236_v2, %v237_v9  ;;  %v254_v14 = vsel %vm128_vm0, %v253_v5, %v1251_v29  ;;  %v292_v15 = vrot.slane %v1259_v33, 7 }
  0x24   :  { %216 = vrot.lane.b32.xlu1 %v215_v0, %s1030_s14  ;;  %230 = vrot.lane.b32.xlu0 %v229_v12, %s1031_s15  ;;  %v240_v16 = vsel %vm133_vm2, %v239_v3, %v238_v13  ;;  %v255_v17 = vsel %vm130_vm1, %v253_v5, %v254_v14  ;;  %v288_v18 = vsel %vm128_vm0, %v287_v11, %v286_v10  ;;  %v300_v19 = vrot.slane %v1251_v29, 3 }
  0x25   :  { %v241_v20 = vsel %vm135_vm3, %v239_v3, %v240_v16  ;;  %v257_v21 = vsel %vm133_vm2, %v256_v6, %v255_v17  ;;  %v289_v22 = vsel %vm130_vm1, %v287_v11, %v288_v18  ;;  %v301_v23 = vrot.slane %v1253_v30, 2 }
  0x26   :  { %v242_v28 = vsel %vm138_vm4, %v1268_v36, %v241_v20  ;;  %v258_v31 = vsel %vm135_vm3, %v256_v6, %v257_v21  ;;  %v290_v24 = vsel %vm133_vm2, %v1257_v32, %v289_v22  ;;  %v304_v34 = vrot.slane %v1257_v32, 1 }
  0x27   :  { %v243_v35 = vsel %vm140_vm5, %v1268_v36, %v242_v28  ;;  %v260_v25 = vsel %vm138_vm4, %v259_v7, %v258_v31  ;;  %v291_v37 = vsel %vm135_vm3, %v1257_v32, %v290_v24  ;;  %v302_v38 = vsel %vm128_vm0, %v301_v23, %v300_v19 }
  0x28   :  { %244 = vrot.lane.b32.xlu0 %v243_v35, %s1032_s16  ;;  %v261_v39 = vsel %vm140_vm5, %v259_v7, %v260_v25  ;;  %v293_v40 = vsel %vm138_vm4, %v292_v15, %v291_v37  ;;  %v303_v41 = vsel %vm130_vm1, %v301_v23, %v302_v38  ;;  %v314_v26 = vcombine.high %v1251_v29, %v1251_v29 }
  0x29   :  { %262 = vrot.lane.b32.xlu1 %v261_v39, %s1033_s17  ;;  %v294_v36 = vsel %vm140_vm5, %v292_v15, %v293_v40  ;;  %v305_v42 = vsel %vm133_vm2, %v304_v34, %v303_v41  ;;  %v315_v43 = vcombine.high %v1253_v30, %v1253_v30  ;;  %v316_v27 = vcombine.high %v1257_v32, %v1257_v32 }
  0x2a   :  { %v306_v44 = vsel %vm135_vm3, %v304_v34, %v305_v42  ;;  %v317_v45 = vcombine.high %v1259_v33, %v1259_v33  ;;  %v332_v46 = vrot.slane %v314_v26, 1  ;;  %v346_v47 = vrot.slane %v314_v26, 2 }
  0x2b   :  { %v307_v29 = vsel %vm138_vm4, %v1259_v33, %v306_v44  ;;  %v318_v48 = vrot.slane %v315_v43, 7  ;;  %v321_v49 = vrot.slane %v316_v27, 6  ;;  %v335_v50 = vrot.slane %v316_v27, 7 }
  0x2c   :  { %295 = vrot.lane.b32.xlu0 %v294_v36, %s1034_s18  ;;  %v308_v30 = vsel %vm140_vm5, %v1259_v33, %v307_v29  ;;  %v324_v51 = vrot.slane %v317_v45, 5  ;;  %v333_v32 = vsel %vm128_vm0, %v315_v43, %v332_v46  ;;  %v338_v52 = vrot.slane %v317_v45, 6  ;;  %s1050_s18 = smov [#allocation6]  }
  0x2d   :  { %309 = vrot.lane.b32.xlu1 %v308_v30, %s1035_s19  ;;  %v319_v53 = vsel %vm128_vm0, %v318_v48, %v314_v26  ;;  %v334_v54 = vsel %vm130_vm1, %v315_v43, %v333_v32  ;;  %v347_v55 = vrot.slane %v315_v43, 1  ;;  %v352_v56 = vrot.slane %v317_v45, 7  ;;  %s899_s19 = sshll.u32 %s1050_s18, 4  ;;  %s900_s19 = int_to_ptr.vmem [resolvable:$true] %s899_s19 }
  0x2e   :  { %v320_v57 = vsel %vm130_vm1, %v318_v48, %v319_v53  ;;  %v336_v58 = vsel %vm133_vm2, %v335_v50, %v334_v54  ;;  %v360_v59 = vrot.slane %v314_v26, 3  ;;  %v361_v60 = vrot.slane %v315_v43, 2  ;;  %p1005_p1 = scmp.lt.s32.totalorder %s900_s19, %s900_s19 }
  0x2f   :  { %v322_v33 = vsel %vm133_vm2, %v321_v49, %v320_v57  ;;  %v337_v61 = vsel %vm135_vm3, %v335_v50, %v336_v58  ;;  %v348_v62 = vsel %vm128_vm0, %v347_v55, %v346_v47  ;;  %v364_v63 = vrot.slane %v316_v27, 1 }
  0x30   :  { %v323_v0 = vsel %vm135_vm3, %v321_v49, %v322_v33  ;;  %v339_v1 = vsel %vm138_vm4, %v338_v52, %v337_v61  ;;  %v349_v2 = vsel %vm130_vm1, %v347_v55, %v348_v62  ;;  %v362_v3 = vsel %vm128_vm0, %v361_v60, %v360_v59 }
  0x31   :  { %v325_v4 = vsel %vm138_vm4, %v324_v51, %v323_v0  ;;  %v340_v5 = vsel %vm140_vm5, %v338_v52, %v339_v1  ;;  %v350_v6 = vsel %vm133_vm2, %v316_v27, %v349_v2  ;;  %v363_v7 = vsel %vm130_vm1, %v361_v60, %v362_v3 }
  0x32   :  { %v326_v8 = vsel %vm140_vm5, %v324_v51, %v325_v4  ;;  %341 = vrot.lane.b32.xlu1 %v340_v5, %s1036_s20  ;;  %v351_v9 = vsel %vm135_vm3, %v316_v27, %v350_v6  ;;  %v365_v10 = vsel %vm133_vm2, %v364_v63, %v363_v7  ;;  %vm119_vm6 = vcmask 1043456  }
  0x33   :  { %327 = vrot.lane.b32.xlu0 %v326_v8, %s1037_s21  ;;  %v353_v11 = vsel %vm138_vm4, %v352_v56, %v351_v9  ;;  %v366_v12 = vsel %vm135_vm3, %v364_v63, %v365_v10  ;;  %vm120_vm7 = vcmask 588804   ;;  %v1038_v15 = vmov 0.0  }
  0x34   :  { %v354_v13 = vsel %vm140_vm5, %v352_v56, %v353_v11  ;;  %v367_v14 = vsel %vm138_vm4, %v317_v45, %v366_v12  ;;  %vm121_vm8 = vmor %vm120_vm7, %vm119_vm6  ;;  %632 = vst [vmem:[#allocation4] sm:$0xff] %v1038_v15  ;;  %572 = vmatprep.mubr.f32.mxu0 %v1038_v15  ;;  %843 = vmatprep.mubr.f32.mxu1 %v1038_v15  ;;  %vm145_vm9 = vcmask 150616   ;;  %vm159_vm10 = vcmask 232616   ;;  %v487_v11 = vld [vmem:[%s1507_s2] sm:$0xff] }
  0x35   :  { %v368_v16 = vsel %vm140_vm5, %v317_v45, %v367_v14  ;;  %122 = vst.msk [vmem:[#allocation2] sm:$0xff] %vm121_vm8, %v1038_v15  ;;  %vm173_vm11 = vcmask 314616   ;;  %vm187_vm12 = vcmask 396616   ;;  %vm205_vm13 = vcmask 478616  }
  0x36   :  { %369 = vrot.lane.b32.xlu1 %v368_v16, %s1039_s22  ;;  %vm219_vm14 = vcmask 560616   ;;  %vm233_vm15 = vcmask 642616   ;;  %vm282_vm0 = vcmask 1044424   ;;  %vm283_vm1 = vcmask 7172  }
  0x37   :  { %355 = vrot.lane.b32.xlu0 %v354_v13, %s1040_s23  ;;  %vm247_vm2 = vcmask 724616   ;;  %vm279_vm3 = vcmask 990208   ;;  %vm265_vm4 = vcmask 970616   ;;  %vm284_vm5 = vmor %vm283_vm1, %vm282_vm0  ;;  %vm298_vm7 = vcmask 85016  }
  0x38   :  { %vm312_vm8 = vcmask 167016   ;;  %vm389_vm0 = vcmask 1039360   ;;  %vm429_vm1 = vcmask 957440   ;;  %v580_v13 = vlaneseq }
  0x3a   :  { %v581_v14 = vshrl.u32 %v580_v13, 7 }
  0x3c   :  { %v582_v16 = vsub.s32 0, %v581_v14 }
  0x85   :  { %v171_v17 = vpop.permute.xlu1 %170  ;;  %v143_v18 = vpop.permute.xlu0 %142 }
  0x86   :  { %146 = vst.msk [vmem:[#allocation2] sm:$0xf] %vm145_vm9, %v143_v18  ;;  %vm330_vm9 = vcmask 249016   ;;  %v586_v18 = vsub.s32 1, %v581_v14 }
  0x89   :  { %v157_v19 = vpop.permute.xlu0 %156  ;;  %v185_v20 = vpop.permute.xlu1 %184 }
  0x8a   :  { %160 = vst.msk [vmem:[#allocation2] sm:$0xf] %vm159_vm10, %v157_v19  ;;  %vm344_vm10 = vcmask 331016  }
  0x8b   :  { %174 = vst.msk [vmem:[#allocation2] sm:$0xf] %vm173_vm11, %v171_v17  ;;  %vm358_vm11 = vcmask 413016   ;;  %v374_v17 = vld [vmem:[%s1513_s8] sm:$0x3] }
  0x8c   :  { %188 = vst.msk [vmem:[#allocation2] sm:$0xf] %vm187_vm12, %v185_v20  ;;  %vm372_vm12 = vcmask 495016   ;;  %v1424_v19 = vrot.slane %v374_v17, %v582_v16  ;;  %v1426_v20 = vrot.slane %v374_v17, %v586_v18 }
  0x92   :  { %v277_v21 = vpop.permute.xlu1 %276  ;;  %v203_v22 = vpop.permute.xlu0 %202 }
  0x93   :  { %206 = vst.msk [vmem:[#allocation2] sm:$0xf] %vm205_vm13, %v203_v22  ;;  %v278_v31 = vrot.slane %v277_v21, 4  ;;  %vm380_vm13 = vcmask 404480  }
  0x95   :  { %v280_v35 = vsel %vm279_vm3, %v278_v31, %v277_v21  ;;  %vm455_vm3 = vcmask 883712  }
  0x96   :  { %v217_v23 = vpop.permute.xlu1 %216  ;;  %v231_v28 = vpop.permute.xlu0 %230 }
  0x97   :  { %220 = vst.msk [vmem:[#allocation2] sm:$0xf] %vm219_vm14, %v217_v23  ;;  %vm394_vm14 = vcmask 408580  }
  0x98   :  { %234 = vst.msk [vmem:[#allocation2] sm:$0xf] %vm233_vm15, %v231_v28  ;;  %vm403_vm15 = vcmask 1031168  }
  0x9a   :  { %v245_v24 = vpop.permute.xlu0 %244 }
  0x9b   :  { %248 = vst.msk [vmem:[#allocation2] sm:$0xf] %vm247_vm2, %v245_v24  ;;  %v263_v34 = vpop.permute.xlu1 %262  ;;  %vm416_vm2 = vcmask 965632  }
  0x9c   :  { %266 = vst.msk [vmem:[#allocation2] sm:$0xf] %vm265_vm4, %v263_v34  ;;  %vm442_vm4 = vcmask 949248  }
  0x9d   :  { %285 = vst.msk [vmem:[#allocation2] sm:$0xff] %vm284_vm5, %v280_v35  ;;  %vm468_vm5 = vcmask 875520  }
  0x9e   :  { %v296_v25 = vpop.permute.xlu0 %295 }
  0x9f   :  { %299 = vst.msk [vmem:[#allocation2 + $0x4] sm:$0xf] %vm298_vm7, %v296_v25  ;;  %v310_v37 = vpop.permute.xlu1 %309  ;;  %vm481_vm7 = vcmask 867328  }
  0xa0   :  { %313 = vst.msk [vmem:[#allocation2 + $0x4] sm:$0xf] %vm312_vm8, %v310_v37  ;;  %vm498_vm8 = vcmask 293888  }
  0xa4   :  { %v342_v38 = vpop.permute.xlu1 %341 }
  0xa5   :  { %v328_v39 = vpop.permute.xlu0 %327 }
  0xa6   :  { %331 = vst.msk [vmem:[#allocation2 + $0x4] sm:$0xf] %vm330_vm9, %v328_v39  ;;  %vm592_vm9 = vcmask 408576  }
  0xa7   :  { %345 = vst.msk [vmem:[#allocation2 + $0x4] sm:$0xf] %vm344_vm10, %v342_v38  ;;  %v1049_v38 = vmov 0   ;;  %vm645_vm10 = vcmask 1047640  }
  0xa8   :  { %v370_v40 = vpop.permute.xlu1 %369  ;;  %992 = vset.pattern.permute.xlu0 %v1049_v38  ;;  %993 = vset.pattern.permute.xlu1 %v1049_v38 }
  0xa9   :  { %v356_v41 = vpop.permute.xlu0 %355 }
  0xaa   :  { %359 = vst.msk [vmem:[#allocation2 + $0x4] sm:$0xf] %vm358_vm11, %v356_v41  ;;  %vm641_vm11 = vcmask 89088  }
  0xab   :  { %373 = vst.msk [vmem:[#allocation2 + $0x4] sm:$0xf] %vm372_vm12, %v370_v40  ;;  %vm647_vm12 = vcmask 498688  }
  0xb2   :  { %v396_v26 = vld [vmem:[#allocation2] sm:$0xff] }
  0xb3   :  { %399 = vrot.lane.b32.xlu0 %v396_v26, %s1041_s24  ;;  %v398_v36 = vcombine.high %v396_v26, %v396_v26  ;;  %387 = vrot.lane.b32.xlu1 %v396_v26, %s1042_s25  ;;  %379 = vst [vmem:[#allocation3] sm:$0xf] %v396_v26  ;;  %v384_v42 = vcombine.low %v396_v26, %v396_v26 }
  0xb5   :  { %381 = vst.msk [vmem:[#allocation3 + $0x8] sm:$0xf] %vm380_vm13, %v398_v36 }
  0xb7   :  { %425 = vrot.lane.b32.xlu0 %v396_v26, %s1043_s26  ;;  %414 = vrot.lane.b32.xlu1 %v396_v26, %s1044_s27 }
  0xbb   :  { %451 = vrot.lane.b32.xlu0 %v396_v26, %s1045_s28  ;;  %440 = vrot.lane.b32.xlu1 %v396_v26, %s1046_s29 }
  0xbf   :  { %401 = vrot.lane.b32.xlu1 %v398_v36, %s1041_s24  ;;  %385 = vrot.lane.b32.xlu0 %v384_v42, %s1042_s25 }
  0xc3   :  { %427 = vrot.lane.b32.xlu1 %v398_v36, %s1043_s26  ;;  %412 = vrot.lane.b32.xlu0 %v384_v42, %s1044_s27 }
  0xc7   :  { %453 = vrot.lane.b32.xlu1 %v398_v36, %s1045_s28  ;;  %438 = vrot.lane.b32.xlu0 %v384_v42, %s1046_s29 }
  0xcb   :  { %466 = vrot.lane.b32.xlu1 %v396_v26, %s1047_s30  ;;  %464 = vrot.lane.b32.xlu0 %v384_v42, %s1047_s30 }
  0xcf   :  { %479 = vrot.lane.b32.xlu1 %v398_v36, %s1048_s10  ;;  %477 = vrot.lane.b32.xlu0 %v396_v26, %s1048_s10 }
 0x125   :  { %v400_v43 = vpop.permute.xlu0 %399  ;;  %v388_v27 = vpop.permute.xlu1 %387 }
 0x126   :  { %395 = vst.msk [vmem:[#allocation3 + $0x8] sm:$0xf0] %vm394_vm14, %v388_v27 }
 0x129   :  { %v426_v44 = vpop.permute.xlu0 %425  ;;  %v415_v45 = vpop.permute.xlu1 %414 }
 0x12a   :  { %421 = vst.msk [vmem:[#allocation3 + $0x18] sm:$0xf0] %vm394_vm14, %v415_v45 }
 0x12d   :  { %v452_v46 = vpop.permute.xlu0 %451  ;;  %v441_v47 = vpop.permute.xlu1 %440  ;;  %v489_v55 = vld [vmem:[#allocation3 + $0x8] sm:$0xff] }
 0x12e   :  { %447 = vst.msk [vmem:[#allocation3 + $0x28] sm:$0xf0] %vm394_vm14, %v441_v47 }
 0x131   :  { %v402_v29 = vpop.permute.xlu1 %401  ;;  %v386_v48 = vpop.permute.xlu0 %385 }
 0x132   :  { %v404_v49 = vsel %vm403_vm15, %v400_v43, %v402_v29  ;;  %408 = vst.msk [vmem:[#allocation3 + $0x18] sm:$0xf] %vm380_vm13, %v402_v29  ;;  %v390_v50 = vsel %vm389_vm0, %v386_v48, %v388_v27  ;;  %v607_v27 = vld [vmem:[%s1508_s3] sm:$0xff] }
 0x133   :  { %407 = vst [vmem:[#allocation3 + $0x10] sm:$0xf] %v404_v49  ;;  %393 = vst [vmem:[#allocation3] sm:$0xf0] %v390_v50 }
 0x135   :  { %v428_v30 = vpop.permute.xlu1 %427  ;;  %v413_v51 = vpop.permute.xlu0 %412 }
 0x136   :  { %v430_v32 = vsel %vm429_vm1, %v426_v44, %v428_v30  ;;  %434 = vst.msk [vmem:[#allocation3 + $0x28] sm:$0xf] %vm380_vm13, %v428_v30  ;;  %v417_v52 = vsel %vm416_vm2, %v413_v51, %v415_v45 }
 0x137   :  { %433 = vst [vmem:[#allocation3 + $0x20] sm:$0xf] %v430_v32  ;;  %420 = vst [vmem:[#allocation3 + $0x10] sm:$0xf0] %v417_v52 }
 0x139   :  { %v454_v53 = vpop.permute.xlu1 %453  ;;  %v439_v54 = vpop.permute.xlu0 %438  ;;  %v491_v56 = vld [vmem:[#allocation3 + $0x18] sm:$0xff] }
 0x13a   :  { %v456_v57 = vsel %vm455_vm3, %v452_v46, %v454_v53  ;;  %460 = vst.msk [vmem:[#allocation3 + $0x38] sm:$0xf] %vm380_vm13, %v454_v53  ;;  %v443_v58 = vsel %vm442_vm4, %v439_v54, %v441_v47  ;;  %v941_v59 = vpack.c.bf16 %v491_v56, %v489_v55  ;;  %v488_v62 = vld [vmem:[#allocation3] sm:$0xff]  ;;  %v611_v46 = vld [vmem:[%s1509_s4] sm:$0xff] }
 0x13b   :  { %459 = vst [vmem:[#allocation3 + $0x30] sm:$0xf] %v456_v57  ;;  %446 = vst [vmem:[#allocation3 + $0x20] sm:$0xf0] %v443_v58 }
 0x13c   :  { %942 = vmatprep.subr.bf16.mxu0 %v941_v59 }
 0x13d   :  { %v467_v60 = vpop.permute.xlu1 %466  ;;  %v465_v33 = vpop.permute.xlu0 %464  ;;  %v493_v4 = vld [vmem:[#allocation3 + $0x28] sm:$0xff] }
 0x13e   :  { %473 = vst.msk [vmem:[#allocation3 + $0x38] sm:$0xf0] %vm394_vm14, %v467_v60  ;;  %v469_v61 = vsel %vm468_vm5, %v465_v33, %v467_v60  ;;  %v490_v63 = vld [vmem:[#allocation3 + $0x10] sm:$0xff] }
 0x13f   :  { %472 = vst [vmem:[#allocation3 + $0x30] sm:$0xf0] %v469_v61  ;;  %v943_v0 = vpack.c.bf16 %v490_v63, %v488_v62 }
 0x141   :  { %v480_v1 = vpop.permute.xlu1 %479  ;;  %v478_v2 = vpop.permute.xlu0 %477  ;;  %944 = vmatpush1.bf16.msra.mxu0 %v943_v0 }
 0x142   :  { %486 = vst.msk [vmem:[#allocation3 + $0x48] sm:$0xf] %vm380_vm13, %v480_v1  ;;  %v482_v3 = vsel %vm481_vm7, %v478_v2, %v480_v1  ;;  %v492_v7 = vld [vmem:[#allocation3 + $0x20] sm:$0xff]  ;;  %vm891_vm13 = vcmask 589200  }
 0x143   :  { %485 = vst [vmem:[#allocation3 + $0x40] sm:$0xf] %v482_v3 }
 0x145   :  { %v495_v5 = vld [vmem:[#allocation3 + $0x38] sm:$0xff] }
 0x146   :  { %v945_v6 = vpack.c.bf16 %v495_v5, %v493_v4  ;;  %v494_v8 = vld [vmem:[#allocation3 + $0x30] sm:$0xff] }
 0x147   :  { %v947_v9 = vpack.c.bf16 %v494_v8, %v492_v7 }
 0x148   :  { %946 = vmatprep.subr.bf16.mxu0 %v945_v6 }
 0x149   :  { %948 = vmatpush1.bf16.msra.mxu0 %v947_v9  ;;  %v497_v10 = vld [vmem:[#allocation3 + $0x48] sm:$0xf] }
 0x14a   :  { %937 = vmatprep.subr.msk.mxu0 %vm119_vm6, %v497_v10  ;;  %v496_v12 = vld [vmem:[#allocation3 + $0x40] sm:$0xf] }
 0x14d   :  { %938 = vmatpush1.msk.msra.mxu0 %vm119_vm6, %v496_v12  ;;  %vm633_vm6 = vcmask 588800  }
 0x14e   :  { %939 = vmatmul.mubr.msk.f32.vlgmr.msra.gmra.mrb[0].mxu0 %vm498_vm8, %v487_v11  ;;  %634 = vst.msk [vmem:[#allocation4 + $0x8] sm:$0xff] %vm633_vm6, %v1038_v15 }
 0x221   :  { %v574_v21 = vpop.f32.mrb[0].mxu0 }
 0x222   :  { %v576_v22 = vpop.f32.mrb[1].mxu0  ;;  %v590_v23 = vmul.f32 %v1424_v19, %v574_v21 }
 0x223   :  { %v591_v28 = vmul.f32 %v1426_v20, %v576_v22 }
 0x224   :  { %v597_v35 = vmul.f32 %v590_v23, %v574_v21 }
 0x225   :  { %v598_v31 = vmul.f32 %v591_v28, %v576_v22  ;;  %v593_v24 = vsel %vm592_vm9, %v591_v28, 0.0 }
 0x226   :  { %v594_v34 = vadd.f32 %v593_v24, %v590_v23 }
 0x227   :  { %v599_v25 = vsel %vm592_vm9, %v598_v31, 0.0 }
 0x228   :  { %595 = vadd.xlane.f32.xlu0 %v594_v34  ;;  %v600_v37 = vadd.f32 %v599_v25, %v597_v35 }
 0x22a   :  { %601 = vadd.xlane.f32.xlu1 %v600_v37 }
 0x2b5   :  { %v596_v39 = vpop.xlane.xlu0 %595 }
 0x2b6   :  { %v603_v40 = vmul.f32 0.0078125, %v596_v39 }
 0x2b7   :  { %v602_v41 = vpop.xlane.xlu1 %601 }
 0x2b8   :  { %v605_v26 = vmul.f32 %v603_v40, %v603_v40  ;;  %v604_v36 = vmul.f32 0.0078125, %v602_v41 }
 0x2ba   :  { %v606_v42 = vsub.f32 %v604_v36, %v605_v26 }
 0x2bc   :  { %v608_v43 = vadd.f32 1e-05, %v606_v42 }
 0x2be   :  { %996 = vrsqrt.f32 %v608_v43 }
 0x2c8   :  { %v997_v44 = vpop.eup %996 }
 0x2c9   :  { %v610_v45 = vmul.f32 %v997_v44, %v607_v27  ;;  %v757_v44 = vld [vmem:[%s1510_s5] sm:$0xff] }
 0x2cb   :  { %616 = vperm.xlu0 %992, %v610_v45   ;;  %v612_v47 = vmul.f32 %v610_v45, %v603_v40 }
 0x2cd   :  { %v613_v29 = vsub.f32 %v611_v46, %v612_v47 }
 0x2cf   :  { %623 = vperm.xlu1 %993, %v613_v29  }
 0x34a   :  { %v617_v48 = vpop.permute.xlu0 %616 }
 0x34b   :  { %v619_v49 = vmul.f32 %v617_v48, %v574_v21  ;;  %v620_v50 = vmul.f32 %v617_v48, %v576_v22 }
 0x34e   :  { %v624_v30 = vpop.permute.xlu1 %623 }
 0x34f   :  { %v626_v51 = vadd.f32 %v624_v30, %v619_v49  ;;  %v627_v32 = vadd.f32 %v624_v30, %v620_v50 }
 0x351   :  { %v628_v52 = vmax.f32 %v626_v51, 0.0  ;;  %v629_v53 = vmax.f32 %v627_v32, 0.0 }
 0x353   :  { %v630_v54 = vmul.f32 %v628_v52, %v1424_v19  ;;  %v631_v55 = vmul.f32 %v629_v53, %v1426_v20 }
 0x355   :  { %637 = vrot.lane.b32.xlu1 %v630_v54, %s1025_s11 }
 0x359   :  { %639 = vrot.lane.b32.xlu1 %v631_v55, %s1025_s11 }
 0x3c7   :  { %v638_v56 = vpop.permute.xlu1 %637 }
 0x3c8   :  { %646 = vst.msk [vmem:[#allocation4] sm:$0xff] %vm645_vm10, %v638_v56 }
 0x3cb   :  { %v640_v57 = vpop.permute.xlu1 %639 }
 0x3cc   :  { %v642_v58 = vsel %vm641_vm11, %v638_v56, %v640_v57 }
 0x3cd   :  { %648 = vst.msk [vmem:[#allocation4 + $0x8] sm:$0xff] %vm647_vm12, %v642_v58 }
 0x3cf   :  { %v649_v59 = vld [vmem:[#allocation4] sm:$0xff] }
 0x3d0   :  { %683 = vrot.lane.b32.xlu0 %v649_v59, %s1044_s27  ;;  %657 = vrot.lane.b32.xlu1 %v649_v59, %s1042_s25 }
 0x3d4   :  { %696 = vrot.lane.b32.xlu0 %v649_v59, %s1043_s26  ;;  %670 = vrot.lane.b32.xlu1 %v649_v59, %s1041_s24  ;;  %v654_v60 = vld [vmem:[#allocation4 + $0x8] sm:$0xff] }
 0x3d5   :  { %652 = vst.msk [vmem:[#allocation5 + $0x8] sm:$0xff] %vm592_vm9, %v654_v60 }
 0x3d8   :  { %709 = vrot.lane.b32.xlu0 %v649_v59, %s1046_s29  ;;  %659 = vrot.lane.b32.xlu1 %v654_v60, %s1042_s25 }
 0x3dc   :  { %722 = vrot.lane.b32.xlu0 %v649_v59, %s1045_s28  ;;  %672 = vrot.lane.b32.xlu1 %v654_v60, %s1041_s24  ;;  %v759_v5 = vld [vmem:[#allocation5 + $0x8] sm:$0xff] }
 0x3e0   :  { %735 = vrot.lane.b32.xlu0 %v649_v59, %s1047_s30  ;;  %685 = vrot.lane.b32.xlu1 %v654_v60, %s1044_s27 }
 0x3e4   :  { %748 = vrot.lane.b32.xlu0 %v649_v59, %s1048_s10  ;;  %698 = vrot.lane.b32.xlu1 %v654_v60, %s1043_s26 }
 0x3e8   :  { %711 = vrot.lane.b32.xlu1 %v654_v60, %s1046_s29 }
 0x3ec   :  { %724 = vrot.lane.b32.xlu1 %v654_v60, %s1045_s28 }
 0x3f0   :  { %737 = vrot.lane.b32.xlu1 %v654_v60, %s1047_s30 }
 0x3f4   :  { %750 = vrot.lane.b32.xlu1 %v654_v60, %s1048_s10  ;;  %v870_v60 = vld [vmem:[%s1512_s7] sm:$0xff] }
 0x442   :  { %v658_v33 = vpop.permute.xlu1 %657  ;;  %v684_v62 = vpop.permute.xlu0 %683 }
 0x446   :  { %v671_v61 = vpop.permute.xlu1 %670  ;;  %v697_v1 = vpop.permute.xlu0 %696 }
 0x44a   :  { %v660_v63 = vpop.permute.xlu1 %659  ;;  %v710_v9 = vpop.permute.xlu0 %709 }
 0x44b   :  { %v661_v0 = vsel %vm389_vm0, %v658_v33, %v660_v63  ;;  %665 = vst.msk [vmem:[#allocation5 + $0x18] sm:$0xff] %vm592_vm9, %v660_v63 }
 0x44c   :  { %v951_v10 = vpack.c.bf16 %v661_v0, %v649_v59 }
 0x44e   :  { %v673_v2 = vpop.permute.xlu1 %672  ;;  %v723_v13 = vpop.permute.xlu0 %722 }
 0x44f   :  { %v674_v3 = vsel %vm403_vm15, %v671_v61, %v673_v2  ;;  %678 = vst.msk [vmem:[#allocation5 + $0x28] sm:$0xff] %vm592_vm9, %v673_v2 }
 0x452   :  { %v686_v4 = vpop.permute.xlu1 %685  ;;  %v761_v6 = vld [vmem:[#allocation5 + $0x18] sm:$0xff]  ;;  %v736_v31 = vpop.permute.xlu0 %735 }
 0x453   :  { %v687_v7 = vsel %vm416_vm2, %v684_v62, %v686_v4  ;;  %691 = vst.msk [vmem:[#allocation5 + $0x38] sm:$0xff] %vm592_vm9, %v686_v4  ;;  %v949_v8 = vpack.c.bf16 %v761_v6, %v759_v5 }
 0x454   :  { %v955_v22 = vpack.c.bf16 %v687_v7, %v674_v3 }
 0x455   :  { %950 = vmatprep.subr.bf16.mxu1 %v949_v8 }
 0x456   :  { %952 = vmatpush1.bf16.msra.mxu1 %v951_v10  ;;  %v699_v11 = vpop.permute.xlu1 %698  ;;  %v763_v16 = vld [vmem:[#allocation5 + $0x28] sm:$0xff]  ;;  %v749_v39 = vpop.permute.xlu0 %748 }
 0x457   :  { %v700_v12 = vsel %vm429_vm1, %v697_v1, %v699_v11  ;;  %704 = vst.msk [vmem:[#allocation5 + $0x48] sm:$0xff] %vm592_vm9, %v699_v11 }
 0x45a   :  { %v712_v14 = vpop.permute.xlu1 %711  ;;  %v765_v17 = vld [vmem:[#allocation5 + $0x38] sm:$0xff] }
 0x45b   :  { %v713_v18 = vsel %vm442_vm4, %v710_v9, %v712_v14  ;;  %717 = vst.msk [vmem:[#allocation5 + $0x58] sm:$0xff] %vm592_vm9, %v712_v14  ;;  %v953_v21 = vpack.c.bf16 %v765_v17, %v763_v16 }
 0x45c   :  { %v959_v38 = vpack.c.bf16 %v713_v18, %v700_v12 }
 0x45d   :  { %954 = vmatprep.subr.bf16.mxu1 %v953_v21 }
 0x45e   :  { %956 = vmatpush1.bf16.msra.mxu1 %v955_v22  ;;  %v725_v23 = vpop.permute.xlu1 %724  ;;  %v767_v34 = vld [vmem:[#allocation5 + $0x48] sm:$0xff] }
 0x45f   :  { %v726_v28 = vsel %vm455_vm3, %v723_v13, %v725_v23  ;;  %730 = vst.msk [vmem:[#allocation5 + $0x68] sm:$0xff] %vm592_vm9, %v725_v23 }
 0x462   :  { %v738_v24 = vpop.permute.xlu1 %737  ;;  %v769_v35 = vld [vmem:[#allocation5 + $0x58] sm:$0xff] }
 0x463   :  { %v739_v25 = vsel %vm468_vm5, %v736_v31, %v738_v24  ;;  %743 = vst.msk [vmem:[#allocation5 + $0x78] sm:$0xff] %vm592_vm9, %v738_v24  ;;  %v957_v37 = vpack.c.bf16 %v769_v35, %v767_v34 }
 0x464   :  { %v963_v43 = vpack.c.bf16 %v739_v25, %v726_v28 }
 0x465   :  { %958 = vmatprep.subr.bf16.mxu1 %v957_v37 }
 0x466   :  { %960 = vmatpush1.bf16.msra.mxu1 %v959_v38  ;;  %v751_v40 = vpop.permute.xlu1 %750  ;;  %v771_v26 = vld [vmem:[#allocation5 + $0x68] sm:$0xff] }
 0x467   :  { %v752_v41 = vsel %vm481_vm7, %v749_v39, %v751_v40  ;;  %756 = vst.msk [vmem:[#allocation5 + $0x88] sm:$0xff] %vm592_vm9, %v751_v40 }
 0x46a   :  { %v773_v36 = vld [vmem:[#allocation5 + $0x78] sm:$0xff] }
 0x46b   :  { %v961_v42 = vpack.c.bf16 %v773_v36, %v771_v26 }
 0x46d   :  { %962 = vmatprep.subr.bf16.mxu1 %v961_v42 }
 0x46e   :  { %964 = vmatpush1.bf16.msra.mxu1 %v963_v43  ;;  %v775_v27 = vld [vmem:[#allocation5 + $0x88] sm:$0xff] }
 0x46f   :  { %795 = vmatprep.subr.mxu1 %v775_v27 }
 0x472   :  { %796 = vmatpush1.msra.mxu1 %v752_v41 }
 0x473   :  { %940 = vmatmul.mubr.msk.f32.vlgmr.msra.gmra.mrb[0].mxu1 %vm633_vm6, %v757_v44 }
 0x546   :  { %v845_v45 = vpop.f32.mrb[0].mxu1 }
 0x547   :  { %v847_v46 = vpop.f32.mrb[1].mxu1  ;;  %v850_v47 = vmul.f32 %v845_v45, %v1424_v19  ;;  %v866_v19 = vld [vmem:[%s1511_s6] sm:$0xff]  ;;  %s1000_s6 = scalar_lea.vmem %s900_s19, 256 }
 0x548   :  { %v851_v29 = vmul.f32 %v847_v46, %v1426_v20  ;;  %p1001_p0 = scmp.ne.s32.totalorder %s900_s19, %s1000_s6  ;;  %p1006_p2 = scmp.lt.s32.totalorder %s1000_s6, %s1000_s6 }
 0x549   :  { %v856_v30 = vmul.f32 %v850_v47, %v845_v45 }
 0x54a   :  { %v857_v48 = vmul.f32 %v851_v29, %v847_v46  ;;  %v852_v49 = vsel %vm592_vm9, %v851_v29, 0.0  ;;  %p1007_p3 = por %p1006_p2, %p1005_p1 }
 0x54b   :  { %v853_v50 = vadd.f32 %v852_v49, %v850_v47 }
 0x54c   :  { %v858_v51 = vsel %vm592_vm9, %v857_v48, 0.0  ;;  %p1008_p4 = pnand %p1007_p3, %p1001_p0 }
 0x54d   :  { %854 = vadd.xlane.f32.xlu0 %v853_v50  ;;  %v859_v32 = vadd.f32 %v858_v51, %v856_v30 }
 0x54f   :  { %860 = vadd.xlane.f32.xlu1 %v859_v32 }
 0x5da   :  { %v855_v52 = vpop.xlane.xlu0 %854 }
 0x5db   :  { %v862_v53 = vmul.f32 0.0078125, %v855_v52 }
 0x5dc   :  { %v861_v54 = vpop.xlane.xlu1 %860 }
 0x5dd   :  { %v864_v55 = vmul.f32 %v862_v53, %v862_v53  ;;  %v863_v56 = vmul.f32 0.0078125, %v861_v54 }
 0x5df   :  { %v865_v57 = vsub.f32 %v863_v56, %v864_v55 }
 0x5e1   :  { %v867_v58 = vadd.f32 1e-05, %v865_v57 }
 0x5e3   :  { %998 = vrsqrt.f32 %v867_v58 }
 0x5ed   :  { %v999_v20 = vpop.eup %998 }
 0x5ee   :  { %v869_v59 = vmul.f32 %v999_v20, %v866_v19 }
 0x5f0   :  { %875 = vperm.xlu0 %992, %v869_v59   ;;  %v871_v33 = vmul.f32 %v869_v59, %v862_v53 }
 0x5f2   :  { %v872_v61 = vsub.f32 %v870_v60, %v871_v33 }
 0x5f4   :  { %882 = vperm.xlu1 %993, %v872_v61  }
 0x66f   :  { %v876_v62 = vpop.permute.xlu0 %875 }
 0x670   :  { %v878_v63 = vmul.f32 %v876_v62, %v845_v45  ;;  %v879_v0 = vmul.f32 %v876_v62, %v847_v46 }
 0x673   :  { %v883_v1 = vpop.permute.xlu1 %882 }
 0x674   :  { %v885_v2 = vadd.f32 %v883_v1, %v878_v63  ;;  %v886_v3 = vadd.f32 %v883_v1, %v879_v0 }
 0x676   :  { %v887_v4 = vmax.f32 %v885_v2, 0.0  ;;  %v888_v5 = vmax.f32 %v886_v3, 0.0 }
 0x678   :  { %889 = vst [vmem:[#allocation6] sm:$0xff] %v887_v4  ;;  %890 = vst.msk [vmem:[#allocation6 + $0x8] sm:$0xff] %vm592_vm9, %v888_v5 }
 0x679   :  { %892 = vst.msk [vmem:[#allocation6 + $0x8] sm:$0xff] %vm891_vm13, %v1038_v15 }
 0x67a   :  { %1011 = shalt.err (!%p1008_p4)
}
 0x67b   :  { %s1012_s21 = scalar_lea.hbm %s1514_s9, 256 }
 0x67c   :  { %p1013_p5 = scmp.ne.s32.totalorder %s1514_s9, %s1012_s21  ;;  %p1016_p6 = scmp.lt.u32.totalorder %s1012_s21, %s1514_s9 }
 0x67e   :  { %p1018_p7 = pnand %p1016_p6, %p1013_p5 }
 0x680   :  { %1021 = shalt.err (!%p1018_p7)
}
 0x681   :  { %902 = dma.vmem_to_hbm [thread:$0]  %s900_s19, 256, %s1514_s9, [#allocation7]  }
 0x682   :  { %1022 = dma.done.wait [#allocation7], 256  }
 0x683   :  { %1023 = vsyncadd [#allocation7], 4294967040 }
 0x684   :  { %906 = vsyncpa [#allocation7], 1 }

</bundles_post_ra>
